<compile_context>
chip_gen: v7x
topology: tpu7x:2x2x1
jax: 0.10.0
libtpu: 0.0.40
codegen_flags: <defaults>
</compile_context>

<pallas_src>
import math
import jax
import jax.numpy as jnp
from jax.experimental import pallas as pl
from jax.experimental.pallas import tpu as pltpu

# ---------------- config implied by the module ----------------
VOCAB = 50          # config.vocab_size
D_MODEL = 32        # config.embedding_dim
NHEAD = 4           # config.trans_nhead
DH = D_MODEL // NHEAD
DIM_FF = 64         # config.trans_dim_feedforward
NUM_LAYERS = 2      # config.trans_num_layers
MAX_LEN = 16        # config.max_seq_length
NUM_CLASSES = 5     # config.num_classes
BATCH = 2
SEQ = 8
EPS = 1e-5          # nn.LayerNorm default eps
NEG_INF = -1e9      # additive key-padding mask value
SQRT_D = math.sqrt(D_MODEL)
INV_SQRT_DH = 1.0 / math.sqrt(DH)


# ---------------- fused Pallas kernel ----------------
def fused_text_transformer_kernel(
        ids_col_ref, ids_row_ref, emb_ref, pe_ref,
        wqkv_ref, bqkv_ref, wo_ref, bo_ref, ln1g_ref, ln1b_ref,
        w1_ref, b1_ref, w2_ref, b2_ref, ln2g_ref, ln2b_ref,
        wfc_ref, bfc_ref, out_ref):
    BS = ids_col_ref.shape[0]          # B * S
    B = ids_row_ref.shape[0]
    S = ids_row_ref.shape[2]

    # ---- embedding: whole-batch one-hot @ table, * sqrt(d_model), + positional encoding ----
    ids_col = ids_col_ref[...]                                          # (B*S, 1) int32
    iota_v = jax.lax.broadcasted_iota(jnp.int32, (BS, VOCAB), 1)
    onehot = (ids_col == iota_v).astype(jnp.float32)                    # (B*S, V)
    x = jnp.dot(onehot, emb_ref[...], preferred_element_type=jnp.float32)  # (B*S, D)
    x = x * SQRT_D
    x = (x.reshape(B, S, D_MODEL) + pe_ref[...][None]).reshape(BS, D_MODEL)
    # dropout == identity (eval mode)

    # ---- padding masks derived in-kernel from the token ids ----
    ids_row = ids_row_ref[...]                                          # (B, 1, S) int32
    mbias = jnp.where(ids_row == 0, NEG_INF, 0.0).astype(jnp.float32)   # (B, 1, S) key mask
    keep = (ids_col != 0).astype(jnp.float32)                           # (B*S, 1)
    cnt = jnp.maximum(jnp.sum((ids_row != 0).astype(jnp.float32), axis=-1), 1.0)  # (B, 1)

    # ---- post-norm TransformerEncoderLayers (relu, batch_first), statically unrolled ----
    for l in range(NUM_LAYERS):
        # fused QKV projection: one (B*S, D) @ (D, 3D) matmul
        qkv = jnp.dot(x, wqkv_ref[l], preferred_element_type=jnp.float32) + bqkv_ref[l]
        q = qkv[:, 0 * D_MODEL:1 * D_MODEL].reshape(B, S, D_MODEL)
        k = qkv[:, 1 * D_MODEL:2 * D_MODEL].reshape(B, S, D_MODEL)
        v = qkv[:, 2 * D_MODEL:3 * D_MODEL].reshape(B, S, D_MODEL)

        # multi-head attention: batched over B, static loop over the 4 heads
        parts = []
        for h in range(NHEAD):
            qh = q[:, :, h * DH:(h + 1) * DH]                           # (B, S, DH)
            kh = k[:, :, h * DH:(h + 1) * DH]
            vh = v[:, :, h * DH:(h + 1) * DH]
            s = jnp.einsum('bqd,bkd->bqk', qh, kh,
                           preferred_element_type=jnp.float32) * INV_SQRT_DH
            s = s + mbias                                               # key-padding mask
            s = s - jnp.max(s, axis=-1, keepdims=True)
            e = jnp.exp(s)
            p = e * pl.reciprocal(jnp.sum(e, axis=-1, keepdims=True), approx=True)
            parts.append(jnp.einsum('bqk,bkd->bqd', p, vh,
                                    preferred_element_type=jnp.float32))
        attn = jnp.concatenate(parts, axis=-1).reshape(BS, D_MODEL)
        attn = jnp.dot(attn, wo_ref[l], preferred_element_type=jnp.float32) + bo_ref[l]

        # residual + LayerNorm 1 (dropout == identity)
        h1 = x + attn
        mu1 = jnp.mean(h1, axis=-1, keepdims=True)
        var1 = jnp.mean(jnp.square(h1 - mu1), axis=-1, keepdims=True)
        h1n = (h1 - mu1) * jax.lax.rsqrt(var1 + EPS) * ln1g_ref[l] + ln1b_ref[l]

        # feed-forward (relu)
        ff = jnp.dot(h1n, w1_ref[l], preferred_element_type=jnp.float32) + b1_ref[l]
        ff = jnp.maximum(ff, 0.0)
        ff = jnp.dot(ff, w2_ref[l], preferred_element_type=jnp.float32) + b2_ref[l]

        # residual + LayerNorm 2
        h2 = h1n + ff
        mu2 = jnp.mean(h2, axis=-1, keepdims=True)
        var2 = jnp.mean(jnp.square(h2 - mu2), axis=-1, keepdims=True)
        x = (h2 - mu2) * jax.lax.rsqrt(var2 + EPS) * ln2g_ref[l] + ln2b_ref[l]

    # ---- masked mean pool over valid tokens (count clamped >= 1) + final Linear ----
    summed = jnp.sum((x * keep).reshape(B, S, D_MODEL), axis=1)         # (B, D)
    pooled = summed / cnt                                               # exact division
    out_ref[...] = jnp.dot(pooled, wfc_ref[...],
                           preferred_element_type=jnp.float32) + bfc_ref[...]


# ---------------- pallas_call wrapper ----------------
def text_transformer_forward(ids, params, pe):
    B, S = ids.shape
    ids_col = ids.astype(jnp.int32).reshape(B * S, 1)    # column layout for one-hot / keep
    ids_row = ids.astype(jnp.int32).reshape(B, 1, S)     # key layout for the attention mask
    pe_slice = pe[0, :S, :]                              # (S, D)

    args = (ids_col, ids_row, params['emb'], pe_slice,
            params['wqkv'], params['bqkv'], params['wo'], params['bo'],
            params['ln1g'], params['ln1b'], params['w1'], params['b1'],
            params['w2'], params['b2'], params['ln2g'], params['ln2b'],
            params['wfc'], params['bfc'])

    vmem = lambda: pl.BlockSpec(memory_space=pltpu.MemorySpace.VMEM)
    return pl.pallas_call(
        fused_text_transformer_kernel,
        out_shape=jax.ShapeDtypeStruct((B, NUM_CLASSES), jnp.float32),
        in_specs=[vmem() for _ in args],
        out_specs=vmem(),
    )(*args)


# ---------------- parameters & positional encoding (plain-JAX glue) ----------------
def make_pe(max_len, d_model):
    position = jnp.arange(max_len, dtype=jnp.float32)[:, None]
    div_term = jnp.exp(jnp.arange(0, d_model, 2, dtype=jnp.float32)
                       * (-math.log(10000.0) / d_model))
    pe = jnp.zeros((max_len, d_model), jnp.float32)
    pe = pe.at[:, 0::2].set(jnp.sin(position * div_term))
    pe = pe.at[:, 1::2].set(jnp.cos(position * div_term))
    return pe[None]                                      # (1, max_len, D)


def init_params(key):
    ks = jax.random.split(key, 2 + NUM_LAYERS)

    def dense(k, shape, scale=0.02):
        return (scale * jax.random.normal(k, shape)).astype(jnp.float32)

    emb = dense(ks[0], (VOCAB, D_MODEL), 1.0)
    emb = emb.at[0].set(0.0)                             # padding_idx=0 row is zero
    wfc = dense(ks[1], (D_MODEL, NUM_CLASSES))
    bfc = jnp.zeros((1, NUM_CLASSES), jnp.float32)

    zeros = lambda *s: jnp.zeros(s, jnp.float32)
    ones = lambda *s: jnp.ones(s, jnp.float32)

    wqkv, bqkv, wo, bo = [], [], [], []
    ln1g, ln1b, w1, b1, w2, b2, ln2g, ln2b = [], [], [], [], [], [], [], []
    for i in range(NUM_LAYERS):
        lk = jax.random.split(ks[2 + i], 6)
        wq = dense(lk[0], (D_MODEL, D_MODEL))
        wk = dense(lk[1], (D_MODEL, D_MODEL))
        wv = dense(lk[2], (D_MODEL, D_MODEL))
        wqkv.append(jnp.concatenate([wq, wk, wv], axis=1))       # packed (D, 3D)
        bqkv.append(zeros(1, 3 * D_MODEL))
        wo.append(dense(lk[3], (D_MODEL, D_MODEL))); bo.append(zeros(1, D_MODEL))
        ln1g.append(ones(1, D_MODEL)); ln1b.append(zeros(1, D_MODEL))
        w1.append(dense(lk[4], (D_MODEL, DIM_FF))); b1.append(zeros(1, DIM_FF))
        w2.append(dense(lk[5], (DIM_FF, D_MODEL))); b2.append(zeros(1, D_MODEL))
        ln2g.append(ones(1, D_MODEL)); ln2b.append(zeros(1, D_MODEL))

    stack = lambda xs: jnp.stack(xs, axis=0)                      # (L, ...) per-layer stacks
    return dict(emb=emb, wfc=wfc, bfc=bfc,
                wqkv=stack(wqkv), bqkv=stack(bqkv), wo=stack(wo), bo=stack(bo),
                ln1g=stack(ln1g), ln1b=stack(ln1b),
                w1=stack(w1), b1=stack(b1), w2=stack(w2), b2=stack(b2),
                ln2g=stack(ln2g), ln2b=stack(ln2b))


if __name__ == "__main__":
    key = jax.random.PRNGKey(0)
    kp, kt = jax.random.split(key)
    params = init_params(kp)
    pe = make_pe(MAX_LEN, D_MODEL)

    ids = jax.random.randint(kt, (BATCH, SEQ), 1, VOCAB, dtype=jnp.int32)
    ids = ids.at[0, 6:].set(0)        # trailing padding tokens
    ids = ids.at[1, 4:].set(0)

    logits = text_transformer_forward(ids, params, pe)
    jax.block_until_ready(logits)
    assert logits.shape == (BATCH, NUM_CLASSES)
    print("KERNEL_OK")
</pallas_src>

<mosaic_0001>
module attributes {stable_mosaic.version = 11 : i64} {
  func.func @fused_text_transformer_kernel(%arg0: memref<16x1xi32, #tpu.memory_space<vmem>>, %arg1: memref<2x1x8xi32, #tpu.memory_space<vmem>>, %arg2: memref<50x32xf32, #tpu.memory_space<vmem>>, %arg3: memref<8x32xf32, #tpu.memory_space<vmem>>, %arg4: memref<2x32x96xf32, #tpu.memory_space<vmem>>, %arg5: memref<2x1x96xf32, #tpu.memory_space<vmem>>, %arg6: memref<2x32x32xf32, #tpu.memory_space<vmem>>, %arg7: memref<2x1x32xf32, #tpu.memory_space<vmem>>, %arg8: memref<2x1x32xf32, #tpu.memory_space<vmem>>, %arg9: memref<2x1x32xf32, #tpu.memory_space<vmem>>, %arg10: memref<2x32x64xf32, #tpu.memory_space<vmem>>, %arg11: memref<2x1x64xf32, #tpu.memory_space<vmem>>, %arg12: memref<2x64x32xf32, #tpu.memory_space<vmem>>, %arg13: memref<2x1x32xf32, #tpu.memory_space<vmem>>, %arg14: memref<2x1x32xf32, #tpu.memory_space<vmem>>, %arg15: memref<2x1x32xf32, #tpu.memory_space<vmem>>, %arg16: memref<32x5xf32, #tpu.memory_space<vmem>>, %arg17: memref<1x5xf32, #tpu.memory_space<vmem>>, %arg18: memref<2x5xf32, #tpu.memory_space<vmem>>) attributes {dimension_semantics = [], scalar_prefetch = 0 : i64, scratch_operands = 0 : i64, tpu.core_type = #tpu.core_type<tc>} {
    %c0 = arith.constant 0 : index
    %c0_0 = arith.constant 0 : index
    %0 = vector.load %arg0[%c0, %c0_0] : memref<16x1xi32, #tpu.memory_space<vmem>>, vector<16x1xi32>
    %1 = tpu.iota {dimensions = array<i32: 1>} : vector<16x50xi32>
    %2 = vector.broadcast %0 : vector<16x1xi32> to vector<16x50xi32>
    %3 = arith.cmpi eq, %2, %1 : vector<16x50xi32>
    %4 = arith.extui %3 : vector<16x50xi1> to vector<16x50xi32>
    %5 = arith.sitofp %4 : vector<16x50xi32> to vector<16x50xf32>
    %c0_1 = arith.constant 0 : index
    %c0_2 = arith.constant 0 : index
    %6 = vector.load %arg2[%c0_1, %c0_2] : memref<50x32xf32, #tpu.memory_space<vmem>>, vector<50x32xf32>
    %cst = arith.constant dense<0.000000e+00> : vector<16x32xf32>
    %7 = tpu.matmul %5, %6, %cst {dimension_numbers = #tpu.dot_dimension_numbers<[1], [0], [0], [1], [0, 0, 1, 1], [], []>} : vector<16x50xf32>, vector<50x32xf32>, vector<16x32xf32> -> vector<16x32xf32>
    %cst_3 = arith.constant 5.65685415 : f32
    %8 = vector.broadcast %cst_3 : f32 to vector<16x32xf32>
    %9 = arith.mulf %7, %8 : vector<16x32xf32>
    %10 = vector.shape_cast %9 : vector<16x32xf32> to vector<2x8x32xf32>
    %c0_4 = arith.constant 0 : index
    %c0_5 = arith.constant 0 : index
    %11 = vector.load %arg3[%c0_4, %c0_5] : memref<8x32xf32, #tpu.memory_space<vmem>>, vector<8x32xf32>
    %12 = vector.shape_cast %11 : vector<8x32xf32> to vector<1x8x32xf32>
    %13 = vector.broadcast %12 : vector<1x8x32xf32> to vector<2x8x32xf32>
    %14 = arith.addf %10, %13 : vector<2x8x32xf32>
    %15 = vector.shape_cast %14 : vector<2x8x32xf32> to vector<16x32xf32>
    %c0_6 = arith.constant 0 : index
    %c0_7 = arith.constant 0 : index
    %c0_8 = arith.constant 0 : index
    %16 = vector.load %arg1[%c0_6, %c0_7, %c0_8] : memref<2x1x8xi32, #tpu.memory_space<vmem>>, vector<2x1x8xi32>
    %c0_i32 = arith.constant 0 : i32
    %17 = vector.broadcast %c0_i32 : i32 to vector<2x1x8xi32>
    %18 = arith.cmpi eq, %16, %17 : vector<2x1x8xi32>
    %cst_9 = arith.constant -1.000000e+09 : f32
    %cst_10 = arith.constant 0.000000e+00 : f32
    %19 = vector.broadcast %cst_9 : f32 to vector<2x1x8xf32>
    %20 = vector.broadcast %cst_10 : f32 to vector<2x1x8xf32>
    %21 = arith.select %18, %19, %20 : vector<2x1x8xi1>, vector<2x1x8xf32>
    %c0_i32_11 = arith.constant 0 : i32
    %22 = vector.broadcast %c0_i32_11 : i32 to vector<16x1xi32>
    %23 = arith.cmpi ne, %0, %22 : vector<16x1xi32>
    %24 = arith.extui %23 : vector<16x1xi1> to vector<16x1xi32>
    %25 = arith.sitofp %24 : vector<16x1xi32> to vector<16x1xf32>
    %c0_i32_12 = arith.constant 0 : i32
    %26 = vector.broadcast %c0_i32_12 : i32 to vector<2x1x8xi32>
    %27 = arith.cmpi ne, %16, %26 : vector<2x1x8xi32>
    %28 = arith.extui %27 : vector<2x1x8xi1> to vector<2x1x8xi32>
    %29 = arith.sitofp %28 : vector<2x1x8xi32> to vector<2x1x8xf32>
    %cst_13 = arith.constant dense<0.000000e+00> : vector<2x1xf32>
    %30 = vector.multi_reduction <add>, %29, %cst_13 [2] : vector<2x1x8xf32> to vector<2x1xf32>
    %cst_14 = arith.constant 1.000000e+00 : f32
    %31 = vector.broadcast %cst_14 : f32 to vector<2x1xf32>
    %32 = arith.maximumf %30, %31 : vector<2x1xf32>
    %c0_15 = arith.constant 0 : index
    %c0_16 = arith.constant 0 : index
    %c0_17 = arith.constant 0 : index
    %33 = vector.load %arg4[%c0_15, %c0_16, %c0_17] : memref<2x32x96xf32, #tpu.memory_space<vmem>>, vector<1x32x96xf32>
    %34 = vector.shape_cast %33 : vector<1x32x96xf32> to vector<32x96xf32>
    %cst_18 = arith.constant dense<0.000000e+00> : vector<16x96xf32>
    %35 = tpu.matmul %15, %34, %cst_18 {dimension_numbers = #tpu.dot_dimension_numbers<[1], [0], [0], [1], [0, 0, 1, 1], [], []>} : vector<16x32xf32>, vector<32x96xf32>, vector<16x96xf32> -> vector<16x96xf32>
    %c0_19 = arith.constant 0 : index
    %c0_20 = arith.constant 0 : index
    %c0_21 = arith.constant 0 : index
    %36 = vector.load %arg5[%c0_19, %c0_20, %c0_21] : memref<2x1x96xf32, #tpu.memory_space<vmem>>, vector<1x1x96xf32>
    %37 = vector.shape_cast %36 : vector<1x1x96xf32> to vector<1x96xf32>
    %38 = vector.broadcast %37 : vector<1x96xf32> to vector<16x96xf32>
    %39 = arith.addf %35, %38 : vector<16x96xf32>
    %40 = vector.extract_strided_slice %39 {offsets = [0, 0], sizes = [16, 32], strides = [1, 1]} : vector<16x96xf32> to vector<16x32xf32>
    %41 = vector.shape_cast %40 : vector<16x32xf32> to vector<2x8x32xf32>
    %42 = vector.extract_strided_slice %39 {offsets = [0, 32], sizes = [16, 32], strides = [1, 1]} : vector<16x96xf32> to vector<16x32xf32>
    %43 = vector.shape_cast %42 : vector<16x32xf32> to vector<2x8x32xf32>
    %44 = vector.extract_strided_slice %39 {offsets = [0, 64], sizes = [16, 32], strides = [1, 1]} : vector<16x96xf32> to vector<16x32xf32>
    %45 = vector.shape_cast %44 : vector<16x32xf32> to vector<2x8x32xf32>
    %46 = vector.extract_strided_slice %41 {offsets = [0, 0, 0], sizes = [2, 8, 8], strides = [1, 1, 1]} : vector<2x8x32xf32> to vector<2x8x8xf32>
    %47 = vector.extract_strided_slice %43 {offsets = [0, 0, 0], sizes = [2, 8, 8], strides = [1, 1, 1]} : vector<2x8x32xf32> to vector<2x8x8xf32>
    %48 = vector.extract_strided_slice %45 {offsets = [0, 0, 0], sizes = [2, 8, 8], strides = [1, 1, 1]} : vector<2x8x32xf32> to vector<2x8x8xf32>
    "tpu.trace_start"() <{level = 10 : i32, message = "bqd,bkd->bqk"}> : () -> ()
    %cst_22 = arith.constant dense<0.000000e+00> : vector<2x8x8xf32>
    %49 = tpu.matmul %46, %47, %cst_22 {dimension_numbers = #tpu.dot_dimension_numbers<[2], [2], [1], [1], [0, 0, 0, 1, 1, 1], [0], [0]>} : vector<2x8x8xf32>, vector<2x8x8xf32>, vector<2x8x8xf32> -> vector<2x8x8xf32>
    "tpu.trace_stop"() : () -> ()
    %cst_23 = arith.constant 0.353553385 : f32
    %50 = vector.broadcast %cst_23 : f32 to vector<2x8x8xf32>
    %51 = arith.mulf %49, %50 : vector<2x8x8xf32>
    %52 = vector.broadcast %21 : vector<2x1x8xf32> to vector<2x8x8xf32>
    %53 = arith.addf %51, %52 : vector<2x8x8xf32>
    %cst_24 = arith.constant dense<0xFF800000> : vector<2x8xf32>
    %54 = vector.multi_reduction <maximumf>, %53, %cst_24 [2] : vector<2x8x8xf32> to vector<2x8xf32>
    %55 = vector.shape_cast %54 : vector<2x8xf32> to vector<2x8x1xf32>
    %56 = vector.broadcast %55 : vector<2x8x1xf32> to vector<2x8x8xf32>
    %57 = arith.subf %53, %56 : vector<2x8x8xf32>
    %58 = math.exp %57 : vector<2x8x8xf32>
    %cst_25 = arith.constant dense<0.000000e+00> : vector<2x8xf32>
    %59 = vector.multi_reduction <add>, %58, %cst_25 [2] : vector<2x8x8xf32> to vector<2x8xf32>
    %60 = vector.shape_cast %59 : vector<2x8xf32> to vector<2x8x1xf32>
    %61 = tpu.reciprocal %60 {approx = true} : vector<2x8x1xf32> -> vector<2x8x1xf32>
    %62 = vector.broadcast %61 : vector<2x8x1xf32> to vector<2x8x8xf32>
    %63 = arith.mulf %58, %62 : vector<2x8x8xf32>
    "tpu.trace_start"() <{level = 10 : i32, message = "bqk,bkd->bqd"}> : () -> ()
    %cst_26 = arith.constant dense<0.000000e+00> : vector<2x8x8xf32>
    %64 = tpu.matmul %63, %48, %cst_26 {dimension_numbers = #tpu.dot_dimension_numbers<[2], [1], [1], [2], [0, 0, 0, 1, 1, 2], [0], [0]>} : vector<2x8x8xf32>, vector<2x8x8xf32>, vector<2x8x8xf32> -> vector<2x8x8xf32>
    "tpu.trace_stop"() : () -> ()
    %65 = vector.extract_strided_slice %41 {offsets = [0, 0, 8], sizes = [2, 8, 8], strides = [1, 1, 1]} : vector<2x8x32xf32> to vector<2x8x8xf32>
    %66 = vector.extract_strided_slice %43 {offsets = [0, 0, 8], sizes = [2, 8, 8], strides = [1, 1, 1]} : vector<2x8x32xf32> to vector<2x8x8xf32>
    %67 = vector.extract_strided_slice %45 {offsets = [0, 0, 8], sizes = [2, 8, 8], strides = [1, 1, 1]} : vector<2x8x32xf32> to vector<2x8x8xf32>
    "tpu.trace_start"() <{level = 10 : i32, message = "bqd,bkd->bqk"}> : () -> ()
    %cst_27 = arith.constant dense<0.000000e+00> : vector<2x8x8xf32>
    %68 = tpu.matmul %65, %66, %cst_27 {dimension_numbers = #tpu.dot_dimension_numbers<[2], [2], [1], [1], [0, 0, 0, 1, 1, 1], [0], [0]>} : vector<2x8x8xf32>, vector<2x8x8xf32>, vector<2x8x8xf32> -> vector<2x8x8xf32>
    "tpu.trace_stop"() : () -> ()
    %cst_28 = arith.constant 0.353553385 : f32
    %69 = vector.broadcast %cst_28 : f32 to vector<2x8x8xf32>
    %70 = arith.mulf %68, %69 : vector<2x8x8xf32>
    %71 = vector.broadcast %21 : vector<2x1x8xf32> to vector<2x8x8xf32>
    %72 = arith.addf %70, %71 : vector<2x8x8xf32>
    %cst_29 = arith.constant dense<0xFF800000> : vector<2x8xf32>
    %73 = vector.multi_reduction <maximumf>, %72, %cst_29 [2] : vector<2x8x8xf32> to vector<2x8xf32>
    %74 = vector.shape_cast %73 : vector<2x8xf32> to vector<2x8x1xf32>
    %75 = vector.broadcast %74 : vector<2x8x1xf32> to vector<2x8x8xf32>
    %76 = arith.subf %72, %75 : vector<2x8x8xf32>
    %77 = math.exp %76 : vector<2x8x8xf32>
    %cst_30 = arith.constant dense<0.000000e+00> : vector<2x8xf32>
    %78 = vector.multi_reduction <add>, %77, %cst_30 [2] : vector<2x8x8xf32> to vector<2x8xf32>
    %79 = vector.shape_cast %78 : vector<2x8xf32> to vector<2x8x1xf32>
    %80 = tpu.reciprocal %79 {approx = true} : vector<2x8x1xf32> -> vector<2x8x1xf32>
    %81 = vector.broadcast %80 : vector<2x8x1xf32> to vector<2x8x8xf32>
    %82 = arith.mulf %77, %81 : vector<2x8x8xf32>
    "tpu.trace_start"() <{level = 10 : i32, message = "bqk,bkd->bqd"}> : () -> ()
    %cst_31 = arith.constant dense<0.000000e+00> : vector<2x8x8xf32>
    %83 = tpu.matmul %82, %67, %cst_31 {dimension_numbers = #tpu.dot_dimension_numbers<[2], [1], [1], [2], [0, 0, 0, 1, 1, 2], [0], [0]>} : vector<2x8x8xf32>, vector<2x8x8xf32>, vector<2x8x8xf32> -> vector<2x8x8xf32>
    "tpu.trace_stop"() : () -> ()
    %84 = vector.extract_strided_slice %41 {offsets = [0, 0, 16], sizes = [2, 8, 8], strides = [1, 1, 1]} : vector<2x8x32xf32> to vector<2x8x8xf32>
    %85 = vector.extract_strided_slice %43 {offsets = [0, 0, 16], sizes = [2, 8, 8], strides = [1, 1, 1]} : vector<2x8x32xf32> to vector<2x8x8xf32>
    %86 = vector.extract_strided_slice %45 {offsets = [0, 0, 16], sizes = [2, 8, 8], strides = [1, 1, 1]} : vector<2x8x32xf32> to vector<2x8x8xf32>
    "tpu.trace_start"() <{level = 10 : i32, message = "bqd,bkd->bqk"}> : () -> ()
    %cst_32 = arith.constant dense<0.000000e+00> : vector<2x8x8xf32>
    %87 = tpu.matmul %84, %85, %cst_32 {dimension_numbers = #tpu.dot_dimension_numbers<[2], [2], [1], [1], [0, 0, 0, 1, 1, 1], [0], [0]>} : vector<2x8x8xf32>, vector<2x8x8xf32>, vector<2x8x8xf32> -> vector<2x8x8xf32>
    "tpu.trace_stop"() : () -> ()
    %cst_33 = arith.constant 0.353553385 : f32
    %88 = vector.broadcast %cst_33 : f32 to vector<2x8x8xf32>
    %89 = arith.mulf %87, %88 : vector<2x8x8xf32>
    %90 = vector.broadcast %21 : vector<2x1x8xf32> to vector<2x8x8xf32>
    %91 = arith.addf %89, %90 : vector<2x8x8xf32>
    %cst_34 = arith.constant dense<0xFF800000> : vector<2x8xf32>
    %92 = vector.multi_reduction <maximumf>, %91, %cst_34 [2] : vector<2x8x8xf32> to vector<2x8xf32>
    %93 = vector.shape_cast %92 : vector<2x8xf32> to vector<2x8x1xf32>
    %94 = vector.broadcast %93 : vector<2x8x1xf32> to vector<2x8x8xf32>
    %95 = arith.subf %91, %94 : vector<2x8x8xf32>
    %96 = math.exp %95 : vector<2x8x8xf32>
    %cst_35 = arith.constant dense<0.000000e+00> : vector<2x8xf32>
    %97 = vector.multi_reduction <add>, %96, %cst_35 [2] : vector<2x8x8xf32> to vector<2x8xf32>
    %98 = vector.shape_cast %97 : vector<2x8xf32> to vector<2x8x1xf32>
    %99 = tpu.reciprocal %98 {approx = true} : vector<2x8x1xf32> -> vector<2x8x1xf32>
    %100 = vector.broadcast %99 : vector<2x8x1xf32> to vector<2x8x8xf32>
    %101 = arith.mulf %96, %100 : vector<2x8x8xf32>
    "tpu.trace_start"() <{level = 10 : i32, message = "bqk,bkd->bqd"}> : () -> ()
    %cst_36 = arith.constant dense<0.000000e+00> : vector<2x8x8xf32>
    %102 = tpu.matmul %101, %86, %cst_36 {dimension_numbers = #tpu.dot_dimension_numbers<[2], [1], [1], [2], [0, 0, 0, 1, 1, 2], [0], [0]>} : vector<2x8x8xf32>, vector<2x8x8xf32>, vector<2x8x8xf32> -> vector<2x8x8xf32>
    "tpu.trace_stop"() : () -> ()
    %103 = vector.extract_strided_slice %41 {offsets = [0, 0, 24], sizes = [2, 8, 8], strides = [1, 1, 1]} : vector<2x8x32xf32> to vector<2x8x8xf32>
    %104 = vector.extract_strided_slice %43 {offsets = [0, 0, 24], sizes = [2, 8, 8], strides = [1, 1, 1]} : vector<2x8x32xf32> to vector<2x8x8xf32>
    %105 = vector.extract_strided_slice %45 {offsets = [0, 0, 24], sizes = [2, 8, 8], strides = [1, 1, 1]} : vector<2x8x32xf32> to vector<2x8x8xf32>
    "tpu.trace_start"() <{level = 10 : i32, message = "bqd,bkd->bqk"}> : () -> ()
    %cst_37 = arith.constant dense<0.000000e+00> : vector<2x8x8xf32>
    %106 = tpu.matmul %103, %104, %cst_37 {dimension_numbers = #tpu.dot_dimension_numbers<[2], [2], [1], [1], [0, 0, 0, 1, 1, 1], [0], [0]>} : vector<2x8x8xf32>, vector<2x8x8xf32>, vector<2x8x8xf32> -> vector<2x8x8xf32>
    "tpu.trace_stop"() : () -> ()
    %cst_38 = arith.constant 0.353553385 : f32
    %107 = vector.broadcast %cst_38 : f32 to vector<2x8x8xf32>
    %108 = arith.mulf %106, %107 : vector<2x8x8xf32>
    %109 = vector.broadcast %21 : vector<2x1x8xf32> to vector<2x8x8xf32>
    %110 = arith.addf %108, %109 : vector<2x8x8xf32>
    %cst_39 = arith.constant dense<0xFF800000> : vector<2x8xf32>
    %111 = vector.multi_reduction <maximumf>, %110, %cst_39 [2] : vector<2x8x8xf32> to vector<2x8xf32>
    %112 = vector.shape_cast %111 : vector<2x8xf32> to vector<2x8x1xf32>
    %113 = vector.broadcast %112 : vector<2x8x1xf32> to vector<2x8x8xf32>
    %114 = arith.subf %110, %113 : vector<2x8x8xf32>
    %115 = math.exp %114 : vector<2x8x8xf32>
    %cst_40 = arith.constant dense<0.000000e+00> : vector<2x8xf32>
    %116 = vector.multi_reduction <add>, %115, %cst_40 [2] : vector<2x8x8xf32> to vector<2x8xf32>
    %117 = vector.shape_cast %116 : vector<2x8xf32> to vector<2x8x1xf32>
    %118 = tpu.reciprocal %117 {approx = true} : vector<2x8x1xf32> -> vector<2x8x1xf32>
    %119 = vector.broadcast %118 : vector<2x8x1xf32> to vector<2x8x8xf32>
    %120 = arith.mulf %115, %119 : vector<2x8x8xf32>
    "tpu.trace_start"() <{level = 10 : i32, message = "bqk,bkd->bqd"}> : () -> ()
    %cst_41 = arith.constant dense<0.000000e+00> : vector<2x8x8xf32>
    %121 = tpu.matmul %120, %105, %cst_41 {dimension_numbers = #tpu.dot_dimension_numbers<[2], [1], [1], [2], [0, 0, 0, 1, 1, 2], [0], [0]>} : vector<2x8x8xf32>, vector<2x8x8xf32>, vector<2x8x8xf32> -> vector<2x8x8xf32>
    "tpu.trace_stop"() : () -> ()
    %122 = tpu.concatenate %64, %83, %102, %121 in 2 : vector<2x8x8xf32>, vector<2x8x8xf32>, vector<2x8x8xf32>, vector<2x8x8xf32> -> vector<2x8x32xf32>
    %123 = vector.shape_cast %122 : vector<2x8x32xf32> to vector<16x32xf32>
    %c0_42 = arith.constant 0 : index
    %c0_43 = arith.constant 0 : index
    %c0_44 = arith.constant 0 : index
    %124 = vector.load %arg6[%c0_42, %c0_43, %c0_44] : memref<2x32x32xf32, #tpu.memory_space<vmem>>, vector<1x32x32xf32>
    %125 = vector.shape_cast %124 : vector<1x32x32xf32> to vector<32x32xf32>
    %cst_45 = arith.constant dense<0.000000e+00> : vector<16x32xf32>
    %126 = tpu.matmul %123, %125, %cst_45 {dimension_numbers = #tpu.dot_dimension_numbers<[1], [0], [0], [1], [0, 0, 1, 1], [], []>} : vector<16x32xf32>, vector<32x32xf32>, vector<16x32xf32> -> vector<16x32xf32>
    %c0_46 = arith.constant 0 : index
    %c0_47 = arith.constant 0 : index
    %c0_48 = arith.constant 0 : index
    %127 = vector.load %arg7[%c0_46, %c0_47, %c0_48] : memref<2x1x32xf32, #tpu.memory_space<vmem>>, vector<1x1x32xf32>
    %128 = vector.shape_cast %127 : vector<1x1x32xf32> to vector<1x32xf32>
    %129 = vector.broadcast %128 : vector<1x32xf32> to vector<16x32xf32>
    %130 = arith.addf %126, %129 : vector<16x32xf32>
    %131 = arith.addf %15, %130 : vector<16x32xf32>
    %cst_49 = arith.constant dense<0.000000e+00> : vector<16xf32>
    %132 = vector.multi_reduction <add>, %131, %cst_49 [1] : vector<16x32xf32> to vector<16xf32>
    %133 = vector.shape_cast %132 : vector<16xf32> to vector<16x1xf32>
    %cst_50 = arith.constant 3.200000e+01 : f32
    %134 = vector.broadcast %cst_50 : f32 to vector<16x1xf32>
    %135 = arith.divf %133, %134 : vector<16x1xf32>
    %136 = vector.broadcast %135 : vector<16x1xf32> to vector<16x32xf32>
    %137 = arith.subf %131, %136 : vector<16x32xf32>
    %138 = arith.mulf %137, %137 : vector<16x32xf32>
    %cst_51 = arith.constant dense<0.000000e+00> : vector<16xf32>
    %139 = vector.multi_reduction <add>, %138, %cst_51 [1] : vector<16x32xf32> to vector<16xf32>
    %140 = vector.shape_cast %139 : vector<16xf32> to vector<16x1xf32>
    %cst_52 = arith.constant 3.200000e+01 : f32
    %141 = vector.broadcast %cst_52 : f32 to vector<16x1xf32>
    %142 = arith.divf %140, %141 : vector<16x1xf32>
    %143 = vector.broadcast %135 : vector<16x1xf32> to vector<16x32xf32>
    %144 = arith.subf %131, %143 : vector<16x32xf32>
    %cst_53 = arith.constant 9.99999974E-6 : f32
    %145 = vector.broadcast %cst_53 : f32 to vector<16x1xf32>
    %146 = arith.addf %142, %145 : vector<16x1xf32>
    %147 = math.rsqrt %146 : vector<16x1xf32>
    %148 = vector.broadcast %147 : vector<16x1xf32> to vector<16x32xf32>
    %149 = arith.mulf %144, %148 : vector<16x32xf32>
    %c0_54 = arith.constant 0 : index
    %c0_55 = arith.constant 0 : index
    %c0_56 = arith.constant 0 : index
    %150 = vector.load %arg8[%c0_54, %c0_55, %c0_56] : memref<2x1x32xf32, #tpu.memory_space<vmem>>, vector<1x1x32xf32>
    %151 = vector.shape_cast %150 : vector<1x1x32xf32> to vector<1x32xf32>
    %152 = vector.broadcast %151 : vector<1x32xf32> to vector<16x32xf32>
    %153 = arith.mulf %149, %152 : vector<16x32xf32>
    %c0_57 = arith.constant 0 : index
    %c0_58 = arith.constant 0 : index
    %c0_59 = arith.constant 0 : index
    %154 = vector.load %arg9[%c0_57, %c0_58, %c0_59] : memref<2x1x32xf32, #tpu.memory_space<vmem>>, vector<1x1x32xf32>
    %155 = vector.shape_cast %154 : vector<1x1x32xf32> to vector<1x32xf32>
    %156 = vector.broadcast %155 : vector<1x32xf32> to vector<16x32xf32>
    %157 = arith.addf %153, %156 : vector<16x32xf32>
    %c0_60 = arith.constant 0 : index
    %c0_61 = arith.constant 0 : index
    %c0_62 = arith.constant 0 : index
    %158 = vector.load %arg10[%c0_60, %c0_61, %c0_62] : memref<2x32x64xf32, #tpu.memory_space<vmem>>, vector<1x32x64xf32>
    %159 = vector.shape_cast %158 : vector<1x32x64xf32> to vector<32x64xf32>
    %cst_63 = arith.constant dense<0.000000e+00> : vector<16x64xf32>
    %160 = tpu.matmul %157, %159, %cst_63 {dimension_numbers = #tpu.dot_dimension_numbers<[1], [0], [0], [1], [0, 0, 1, 1], [], []>} : vector<16x32xf32>, vector<32x64xf32>, vector<16x64xf32> -> vector<16x64xf32>
    %c0_64 = arith.constant 0 : index
    %c0_65 = arith.constant 0 : index
    %c0_66 = arith.constant 0 : index
    %161 = vector.load %arg11[%c0_64, %c0_65, %c0_66] : memref<2x1x64xf32, #tpu.memory_space<vmem>>, vector<1x1x64xf32>
    %162 = vector.shape_cast %161 : vector<1x1x64xf32> to vector<1x64xf32>
    %163 = vector.broadcast %162 : vector<1x64xf32> to vector<16x64xf32>
    %164 = arith.addf %160, %163 : vector<16x64xf32>
    %cst_67 = arith.constant 0.000000e+00 : f32
    %165 = vector.broadcast %cst_67 : f32 to vector<16x64xf32>
    %166 = arith.maximumf %164, %165 : vector<16x64xf32>
    %c0_68 = arith.constant 0 : index
    %c0_69 = arith.constant 0 : index
    %c0_70 = arith.constant 0 : index
    %167 = vector.load %arg12[%c0_68, %c0_69, %c0_70] : memref<2x64x32xf32, #tpu.memory_space<vmem>>, vector<1x64x32xf32>
    %168 = vector.shape_cast %167 : vector<1x64x32xf32> to vector<64x32xf32>
    %cst_71 = arith.constant dense<0.000000e+00> : vector<16x32xf32>
    %169 = tpu.matmul %166, %168, %cst_71 {dimension_numbers = #tpu.dot_dimension_numbers<[1], [0], [0], [1], [0, 0, 1, 1], [], []>} : vector<16x64xf32>, vector<64x32xf32>, vector<16x32xf32> -> vector<16x32xf32>
    %c0_72 = arith.constant 0 : index
    %c0_73 = arith.constant 0 : index
    %c0_74 = arith.constant 0 : index
    %170 = vector.load %arg13[%c0_72, %c0_73, %c0_74] : memref<2x1x32xf32, #tpu.memory_space<vmem>>, vector<1x1x32xf32>
    %171 = vector.shape_cast %170 : vector<1x1x32xf32> to vector<1x32xf32>
    %172 = vector.broadcast %171 : vector<1x32xf32> to vector<16x32xf32>
    %173 = arith.addf %169, %172 : vector<16x32xf32>
    %174 = arith.addf %157, %173 : vector<16x32xf32>
    %cst_75 = arith.constant dense<0.000000e+00> : vector<16xf32>
    %175 = vector.multi_reduction <add>, %174, %cst_75 [1] : vector<16x32xf32> to vector<16xf32>
    %176 = vector.shape_cast %175 : vector<16xf32> to vector<16x1xf32>
    %cst_76 = arith.constant 3.200000e+01 : f32
    %177 = vector.broadcast %cst_76 : f32 to vector<16x1xf32>
    %178 = arith.divf %176, %177 : vector<16x1xf32>
    %179 = vector.broadcast %178 : vector<16x1xf32> to vector<16x32xf32>
    %180 = arith.subf %174, %179 : vector<16x32xf32>
    %181 = arith.mulf %180, %180 : vector<16x32xf32>
    %cst_77 = arith.constant dense<0.000000e+00> : vector<16xf32>
    %182 = vector.multi_reduction <add>, %181, %cst_77 [1] : vector<16x32xf32> to vector<16xf32>
    %183 = vector.shape_cast %182 : vector<16xf32> to vector<16x1xf32>
    %cst_78 = arith.constant 3.200000e+01 : f32
    %184 = vector.broadcast %cst_78 : f32 to vector<16x1xf32>
    %185 = arith.divf %183, %184 : vector<16x1xf32>
    %186 = vector.broadcast %178 : vector<16x1xf32> to vector<16x32xf32>
    %187 = arith.subf %174, %186 : vector<16x32xf32>
    %cst_79 = arith.constant 9.99999974E-6 : f32
    %188 = vector.broadcast %cst_79 : f32 to vector<16x1xf32>
    %189 = arith.addf %185, %188 : vector<16x1xf32>
    %190 = math.rsqrt %189 : vector<16x1xf32>
    %191 = vector.broadcast %190 : vector<16x1xf32> to vector<16x32xf32>
    %192 = arith.mulf %187, %191 : vector<16x32xf32>
    %c0_80 = arith.constant 0 : index
    %c0_81 = arith.constant 0 : index
    %c0_82 = arith.constant 0 : index
    %193 = vector.load %arg14[%c0_80, %c0_81, %c0_82] : memref<2x1x32xf32, #tpu.memory_space<vmem>>, vector<1x1x32xf32>
    %194 = vector.shape_cast %193 : vector<1x1x32xf32> to vector<1x32xf32>
    %195 = vector.broadcast %194 : vector<1x32xf32> to vector<16x32xf32>
    %196 = arith.mulf %192, %195 : vector<16x32xf32>
    %c0_83 = arith.constant 0 : index
    %c0_84 = arith.constant 0 : index
    %c0_85 = arith.constant 0 : index
    %197 = vector.load %arg15[%c0_83, %c0_84, %c0_85] : memref<2x1x32xf32, #tpu.memory_space<vmem>>, vector<1x1x32xf32>
    %198 = vector.shape_cast %197 : vector<1x1x32xf32> to vector<1x32xf32>
    %199 = vector.broadcast %198 : vector<1x32xf32> to vector<16x32xf32>
    %200 = arith.addf %196, %199 : vector<16x32xf32>
    %c1 = arith.constant 1 : index
    %c0_86 = arith.constant 0 : index
    %c0_87 = arith.constant 0 : index
    %201 = vector.load %arg4[%c1, %c0_86, %c0_87] : memref<2x32x96xf32, #tpu.memory_space<vmem>>, vector<1x32x96xf32>
    %202 = vector.shape_cast %201 : vector<1x32x96xf32> to vector<32x96xf32>
    %cst_88 = arith.constant dense<0.000000e+00> : vector<16x96xf32>
    %203 = tpu.matmul %200, %202, %cst_88 {dimension_numbers = #tpu.dot_dimension_numbers<[1], [0], [0], [1], [0, 0, 1, 1], [], []>} : vector<16x32xf32>, vector<32x96xf32>, vector<16x96xf32> -> vector<16x96xf32>
    %c1_89 = arith.constant 1 : index
    %c0_90 = arith.constant 0 : index
    %c0_91 = arith.constant 0 : index
    %204 = vector.load %arg5[%c1_89, %c0_90, %c0_91] : memref<2x1x96xf32, #tpu.memory_space<vmem>>, vector<1x1x96xf32>
    %205 = vector.shape_cast %204 : vector<1x1x96xf32> to vector<1x96xf32>
    %206 = vector.broadcast %205 : vector<1x96xf32> to vector<16x96xf32>
    %207 = arith.addf %203, %206 : vector<16x96xf32>
    %208 = vector.extract_strided_slice %207 {offsets = [0, 0], sizes = [16, 32], strides = [1, 1]} : vector<16x96xf32> to vector<16x32xf32>
    %209 = vector.shape_cast %208 : vector<16x32xf32> to vector<2x8x32xf32>
    %210 = vector.extract_strided_slice %207 {offsets = [0, 32], sizes = [16, 32], strides = [1, 1]} : vector<16x96xf32> to vector<16x32xf32>
    %211 = vector.shape_cast %210 : vector<16x32xf32> to vector<2x8x32xf32>
    %212 = vector.extract_strided_slice %207 {offsets = [0, 64], sizes = [16, 32], strides = [1, 1]} : vector<16x96xf32> to vector<16x32xf32>
    %213 = vector.shape_cast %212 : vector<16x32xf32> to vector<2x8x32xf32>
    %214 = vector.extract_strided_slice %209 {offsets = [0, 0, 0], sizes = [2, 8, 8], strides = [1, 1, 1]} : vector<2x8x32xf32> to vector<2x8x8xf32>
    %215 = vector.extract_strided_slice %211 {offsets = [0, 0, 0], sizes = [2, 8, 8], strides = [1, 1, 1]} : vector<2x8x32xf32> to vector<2x8x8xf32>
    %216 = vector.extract_strided_slice %213 {offsets = [0, 0, 0], sizes = [2, 8, 8], strides = [1, 1, 1]} : vector<2x8x32xf32> to vector<2x8x8xf32>
    "tpu.trace_start"() <{level = 10 : i32, message = "bqd,bkd->bqk"}> : () -> ()
    %cst_92 = arith.constant dense<0.000000e+00> : vector<2x8x8xf32>
    %217 = tpu.matmul %214, %215, %cst_92 {dimension_numbers = #tpu.dot_dimension_numbers<[2], [2], [1], [1], [0, 0, 0, 1, 1, 1], [0], [0]>} : vector<2x8x8xf32>, vector<2x8x8xf32>, vector<2x8x8xf32> -> vector<2x8x8xf32>
    "tpu.trace_stop"() : () -> ()
    %cst_93 = arith.constant 0.353553385 : f32
    %218 = vector.broadcast %cst_93 : f32 to vector<2x8x8xf32>
    %219 = arith.mulf %217, %218 : vector<2x8x8xf32>
    %220 = vector.broadcast %21 : vector<2x1x8xf32> to vector<2x8x8xf32>
    %221 = arith.addf %219, %220 : vector<2x8x8xf32>
    %cst_94 = arith.constant dense<0xFF800000> : vector<2x8xf32>
    %222 = vector.multi_reduction <maximumf>, %221, %cst_94 [2] : vector<2x8x8xf32> to vector<2x8xf32>
    %223 = vector.shape_cast %222 : vector<2x8xf32> to vector<2x8x1xf32>
    %224 = vector.broadcast %223 : vector<2x8x1xf32> to vector<2x8x8xf32>
    %225 = arith.subf %221, %224 : vector<2x8x8xf32>
    %226 = math.exp %225 : vector<2x8x8xf32>
    %cst_95 = arith.constant dense<0.000000e+00> : vector<2x8xf32>
    %227 = vector.multi_reduction <add>, %226, %cst_95 [2] : vector<2x8x8xf32> to vector<2x8xf32>
    %228 = vector.shape_cast %227 : vector<2x8xf32> to vector<2x8x1xf32>
    %229 = tpu.reciprocal %228 {approx = true} : vector<2x8x1xf32> -> vector<2x8x1xf32>
    %230 = vector.broadcast %229 : vector<2x8x1xf32> to vector<2x8x8xf32>
    %231 = arith.mulf %226, %230 : vector<2x8x8xf32>
    "tpu.trace_start"() <{level = 10 : i32, message = "bqk,bkd->bqd"}> : () -> ()
    %cst_96 = arith.constant dense<0.000000e+00> : vector<2x8x8xf32>
    %232 = tpu.matmul %231, %216, %cst_96 {dimension_numbers = #tpu.dot_dimension_numbers<[2], [1], [1], [2], [0, 0, 0, 1, 1, 2], [0], [0]>} : vector<2x8x8xf32>, vector<2x8x8xf32>, vector<2x8x8xf32> -> vector<2x8x8xf32>
    "tpu.trace_stop"() : () -> ()
    %233 = vector.extract_strided_slice %209 {offsets = [0, 0, 8], sizes = [2, 8, 8], strides = [1, 1, 1]} : vector<2x8x32xf32> to vector<2x8x8xf32>
    %234 = vector.extract_strided_slice %211 {offsets = [0, 0, 8], sizes = [2, 8, 8], strides = [1, 1, 1]} : vector<2x8x32xf32> to vector<2x8x8xf32>
    %235 = vector.extract_strided_slice %213 {offsets = [0, 0, 8], sizes = [2, 8, 8], strides = [1, 1, 1]} : vector<2x8x32xf32> to vector<2x8x8xf32>
    "tpu.trace_start"() <{level = 10 : i32, message = "bqd,bkd->bqk"}> : () -> ()
    %cst_97 = arith.constant dense<0.000000e+00> : vector<2x8x8xf32>
    %236 = tpu.matmul %233, %234, %cst_97 {dimension_numbers = #tpu.dot_dimension_numbers<[2], [2], [1], [1], [0, 0, 0, 1, 1, 1], [0], [0]>} : vector<2x8x8xf32>, vector<2x8x8xf32>, vector<2x8x8xf32> -> vector<2x8x8xf32>
    "tpu.trace_stop"() : () -> ()
    %cst_98 = arith.constant 0.353553385 : f32
    %237 = vector.broadcast %cst_98 : f32 to vector<2x8x8xf32>
    %238 = arith.mulf %236, %237 : vector<2x8x8xf32>
    %239 = vector.broadcast %21 : vector<2x1x8xf32> to vector<2x8x8xf32>
    %240 = arith.addf %238, %239 : vector<2x8x8xf32>
    %cst_99 = arith.constant dense<0xFF800000> : vector<2x8xf32>
    %241 = vector.multi_reduction <maximumf>, %240, %cst_99 [2] : vector<2x8x8xf32> to vector<2x8xf32>
    %242 = vector.shape_cast %241 : vector<2x8xf32> to vector<2x8x1xf32>
    %243 = vector.broadcast %242 : vector<2x8x1xf32> to vector<2x8x8xf32>
    %244 = arith.subf %240, %243 : vector<2x8x8xf32>
    %245 = math.exp %244 : vector<2x8x8xf32>
    %cst_100 = arith.constant dense<0.000000e+00> : vector<2x8xf32>
    %246 = vector.multi_reduction <add>, %245, %cst_100 [2] : vector<2x8x8xf32> to vector<2x8xf32>
    %247 = vector.shape_cast %246 : vector<2x8xf32> to vector<2x8x1xf32>
    %248 = tpu.reciprocal %247 {approx = true} : vector<2x8x1xf32> -> vector<2x8x1xf32>
    %249 = vector.broadcast %248 : vector<2x8x1xf32> to vector<2x8x8xf32>
    %250 = arith.mulf %245, %249 : vector<2x8x8xf32>
    "tpu.trace_start"() <{level = 10 : i32, message = "bqk,bkd->bqd"}> : () -> ()
    %cst_101 = arith.constant dense<0.000000e+00> : vector<2x8x8xf32>
    %251 = tpu.matmul %250, %235, %cst_101 {dimension_numbers = #tpu.dot_dimension_numbers<[2], [1], [1], [2], [0, 0, 0, 1, 1, 2], [0], [0]>} : vector<2x8x8xf32>, vector<2x8x8xf32>, vector<2x8x8xf32> -> vector<2x8x8xf32>
    "tpu.trace_stop"() : () -> ()
    %252 = vector.extract_strided_slice %209 {offsets = [0, 0, 16], sizes = [2, 8, 8], strides = [1, 1, 1]} : vector<2x8x32xf32> to vector<2x8x8xf32>
    %253 = vector.extract_strided_slice %211 {offsets = [0, 0, 16], sizes = [2, 8, 8], strides = [1, 1, 1]} : vector<2x8x32xf32> to vector<2x8x8xf32>
    %254 = vector.extract_strided_slice %213 {offsets = [0, 0, 16], sizes = [2, 8, 8], strides = [1, 1, 1]} : vector<2x8x32xf32> to vector<2x8x8xf32>
    "tpu.trace_start"() <{level = 10 : i32, message = "bqd,bkd->bqk"}> : () -> ()
    %cst_102 = arith.constant dense<0.000000e+00> : vector<2x8x8xf32>
    %255 = tpu.matmul %252, %253, %cst_102 {dimension_numbers = #tpu.dot_dimension_numbers<[2], [2], [1], [1], [0, 0, 0, 1, 1, 1], [0], [0]>} : vector<2x8x8xf32>, vector<2x8x8xf32>, vector<2x8x8xf32> -> vector<2x8x8xf32>
    "tpu.trace_stop"() : () -> ()
    %cst_103 = arith.constant 0.353553385 : f32
    %256 = vector.broadcast %cst_103 : f32 to vector<2x8x8xf32>
    %257 = arith.mulf %255, %256 : vector<2x8x8xf32>
    %258 = vector.broadcast %21 : vector<2x1x8xf32> to vector<2x8x8xf32>
    %259 = arith.addf %257, %258 : vector<2x8x8xf32>
    %cst_104 = arith.constant dense<0xFF800000> : vector<2x8xf32>
    %260 = vector.multi_reduction <maximumf>, %259, %cst_104 [2] : vector<2x8x8xf32> to vector<2x8xf32>
    %261 = vector.shape_cast %260 : vector<2x8xf32> to vector<2x8x1xf32>
    %262 = vector.broadcast %261 : vector<2x8x1xf32> to vector<2x8x8xf32>
    %263 = arith.subf %259, %262 : vector<2x8x8xf32>
    %264 = math.exp %263 : vector<2x8x8xf32>
    %cst_105 = arith.constant dense<0.000000e+00> : vector<2x8xf32>
    %265 = vector.multi_reduction <add>, %264, %cst_105 [2] : vector<2x8x8xf32> to vector<2x8xf32>
    %266 = vector.shape_cast %265 : vector<2x8xf32> to vector<2x8x1xf32>
    %267 = tpu.reciprocal %266 {approx = true} : vector<2x8x1xf32> -> vector<2x8x1xf32>
    %268 = vector.broadcast %267 : vector<2x8x1xf32> to vector<2x8x8xf32>
    %269 = arith.mulf %264, %268 : vector<2x8x8xf32>
    "tpu.trace_start"() <{level = 10 : i32, message = "bqk,bkd->bqd"}> : () -> ()
    %cst_106 = arith.constant dense<0.000000e+00> : vector<2x8x8xf32>
    %270 = tpu.matmul %269, %254, %cst_106 {dimension_numbers = #tpu.dot_dimension_numbers<[2], [1], [1], [2], [0, 0, 0, 1, 1, 2], [0], [0]>} : vector<2x8x8xf32>, vector<2x8x8xf32>, vector<2x8x8xf32> -> vector<2x8x8xf32>
    "tpu.trace_stop"() : () -> ()
    %271 = vector.extract_strided_slice %209 {offsets = [0, 0, 24], sizes = [2, 8, 8], strides = [1, 1, 1]} : vector<2x8x32xf32> to vector<2x8x8xf32>
    %272 = vector.extract_strided_slice %211 {offsets = [0, 0, 24], sizes = [2, 8, 8], strides = [1, 1, 1]} : vector<2x8x32xf32> to vector<2x8x8xf32>
    %273 = vector.extract_strided_slice %213 {offsets = [0, 0, 24], sizes = [2, 8, 8], strides = [1, 1, 1]} : vector<2x8x32xf32> to vector<2x8x8xf32>
    "tpu.trace_start"() <{level = 10 : i32, message = "bqd,bkd->bqk"}> : () -> ()
    %cst_107 = arith.constant dense<0.000000e+00> : vector<2x8x8xf32>
    %274 = tpu.matmul %271, %272, %cst_107 {dimension_numbers = #tpu.dot_dimension_numbers<[2], [2], [1], [1], [0, 0, 0, 1, 1, 1], [0], [0]>} : vector<2x8x8xf32>, vector<2x8x8xf32>, vector<2x8x8xf32> -> vector<2x8x8xf32>
    "tpu.trace_stop"() : () -> ()
    %cst_108 = arith.constant 0.353553385 : f32
    %275 = vector.broadcast %cst_108 : f32 to vector<2x8x8xf32>
    %276 = arith.mulf %274, %275 : vector<2x8x8xf32>
    %277 = vector.broadcast %21 : vector<2x1x8xf32> to vector<2x8x8xf32>
    %278 = arith.addf %276, %277 : vector<2x8x8xf32>
    %cst_109 = arith.constant dense<0xFF800000> : vector<2x8xf32>
    %279 = vector.multi_reduction <maximumf>, %278, %cst_109 [2] : vector<2x8x8xf32> to vector<2x8xf32>
    %280 = vector.shape_cast %279 : vector<2x8xf32> to vector<2x8x1xf32>
    %281 = vector.broadcast %280 : vector<2x8x1xf32> to vector<2x8x8xf32>
    %282 = arith.subf %278, %281 : vector<2x8x8xf32>
    %283 = math.exp %282 : vector<2x8x8xf32>
    %cst_110 = arith.constant dense<0.000000e+00> : vector<2x8xf32>
    %284 = vector.multi_reduction <add>, %283, %cst_110 [2] : vector<2x8x8xf32> to vector<2x8xf32>
    %285 = vector.shape_cast %284 : vector<2x8xf32> to vector<2x8x1xf32>
    %286 = tpu.reciprocal %285 {approx = true} : vector<2x8x1xf32> -> vector<2x8x1xf32>
    %287 = vector.broadcast %286 : vector<2x8x1xf32> to vector<2x8x8xf32>
    %288 = arith.mulf %283, %287 : vector<2x8x8xf32>
    "tpu.trace_start"() <{level = 10 : i32, message = "bqk,bkd->bqd"}> : () -> ()
    %cst_111 = arith.constant dense<0.000000e+00> : vector<2x8x8xf32>
    %289 = tpu.matmul %288, %273, %cst_111 {dimension_numbers = #tpu.dot_dimension_numbers<[2], [1], [1], [2], [0, 0, 0, 1, 1, 2], [0], [0]>} : vector<2x8x8xf32>, vector<2x8x8xf32>, vector<2x8x8xf32> -> vector<2x8x8xf32>
    "tpu.trace_stop"() : () -> ()
    %290 = tpu.concatenate %232, %251, %270, %289 in 2 : vector<2x8x8xf32>, vector<2x8x8xf32>, vector<2x8x8xf32>, vector<2x8x8xf32> -> vector<2x8x32xf32>
    %291 = vector.shape_cast %290 : vector<2x8x32xf32> to vector<16x32xf32>
    %c1_112 = arith.constant 1 : index
    %c0_113 = arith.constant 0 : index
    %c0_114 = arith.constant 0 : index
    %292 = vector.load %arg6[%c1_112, %c0_113, %c0_114] : memref<2x32x32xf32, #tpu.memory_space<vmem>>, vector<1x32x32xf32>
    %293 = vector.shape_cast %292 : vector<1x32x32xf32> to vector<32x32xf32>
    %cst_115 = arith.constant dense<0.000000e+00> : vector<16x32xf32>
    %294 = tpu.matmul %291, %293, %cst_115 {dimension_numbers = #tpu.dot_dimension_numbers<[1], [0], [0], [1], [0, 0, 1, 1], [], []>} : vector<16x32xf32>, vector<32x32xf32>, vector<16x32xf32> -> vector<16x32xf32>
    %c1_116 = arith.constant 1 : index
    %c0_117 = arith.constant 0 : index
    %c0_118 = arith.constant 0 : index
    %295 = vector.load %arg7[%c1_116, %c0_117, %c0_118] : memref<2x1x32xf32, #tpu.memory_space<vmem>>, vector<1x1x32xf32>
    %296 = vector.shape_cast %295 : vector<1x1x32xf32> to vector<1x32xf32>
    %297 = vector.broadcast %296 : vector<1x32xf32> to vector<16x32xf32>
    %298 = arith.addf %294, %297 : vector<16x32xf32>
    %299 = arith.addf %200, %298 : vector<16x32xf32>
    %cst_119 = arith.constant dense<0.000000e+00> : vector<16xf32>
    %300 = vector.multi_reduction <add>, %299, %cst_119 [1] : vector<16x32xf32> to vector<16xf32>
    %301 = vector.shape_cast %300 : vector<16xf32> to vector<16x1xf32>
    %cst_120 = arith.constant 3.200000e+01 : f32
    %302 = vector.broadcast %cst_120 : f32 to vector<16x1xf32>
    %303 = arith.divf %301, %302 : vector<16x1xf32>
    %304 = vector.broadcast %303 : vector<16x1xf32> to vector<16x32xf32>
    %305 = arith.subf %299, %304 : vector<16x32xf32>
    %306 = arith.mulf %305, %305 : vector<16x32xf32>
    %cst_121 = arith.constant dense<0.000000e+00> : vector<16xf32>
    %307 = vector.multi_reduction <add>, %306, %cst_121 [1] : vector<16x32xf32> to vector<16xf32>
    %308 = vector.shape_cast %307 : vector<16xf32> to vector<16x1xf32>
    %cst_122 = arith.constant 3.200000e+01 : f32
    %309 = vector.broadcast %cst_122 : f32 to vector<16x1xf32>
    %310 = arith.divf %308, %309 : vector<16x1xf32>
    %311 = vector.broadcast %303 : vector<16x1xf32> to vector<16x32xf32>
    %312 = arith.subf %299, %311 : vector<16x32xf32>
    %cst_123 = arith.constant 9.99999974E-6 : f32
    %313 = vector.broadcast %cst_123 : f32 to vector<16x1xf32>
    %314 = arith.addf %310, %313 : vector<16x1xf32>
    %315 = math.rsqrt %314 : vector<16x1xf32>
    %316 = vector.broadcast %315 : vector<16x1xf32> to vector<16x32xf32>
    %317 = arith.mulf %312, %316 : vector<16x32xf32>
    %c1_124 = arith.constant 1 : index
    %c0_125 = arith.constant 0 : index
    %c0_126 = arith.constant 0 : index
    %318 = vector.load %arg8[%c1_124, %c0_125, %c0_126] : memref<2x1x32xf32, #tpu.memory_space<vmem>>, vector<1x1x32xf32>
    %319 = vector.shape_cast %318 : vector<1x1x32xf32> to vector<1x32xf32>
    %320 = vector.broadcast %319 : vector<1x32xf32> to vector<16x32xf32>
    %321 = arith.mulf %317, %320 : vector<16x32xf32>
    %c1_127 = arith.constant 1 : index
    %c0_128 = arith.constant 0 : index
    %c0_129 = arith.constant 0 : index
    %322 = vector.load %arg9[%c1_127, %c0_128, %c0_129] : memref<2x1x32xf32, #tpu.memory_space<vmem>>, vector<1x1x32xf32>
    %323 = vector.shape_cast %322 : vector<1x1x32xf32> to vector<1x32xf32>
    %324 = vector.broadcast %323 : vector<1x32xf32> to vector<16x32xf32>
    %325 = arith.addf %321, %324 : vector<16x32xf32>
    %c1_130 = arith.constant 1 : index
    %c0_131 = arith.constant 0 : index
    %c0_132 = arith.constant 0 : index
    %326 = vector.load %arg10[%c1_130, %c0_131, %c0_132] : memref<2x32x64xf32, #tpu.memory_space<vmem>>, vector<1x32x64xf32>
    %327 = vector.shape_cast %326 : vector<1x32x64xf32> to vector<32x64xf32>
    %cst_133 = arith.constant dense<0.000000e+00> : vector<16x64xf32>
    %328 = tpu.matmul %325, %327, %cst_133 {dimension_numbers = #tpu.dot_dimension_numbers<[1], [0], [0], [1], [0, 0, 1, 1], [], []>} : vector<16x32xf32>, vector<32x64xf32>, vector<16x64xf32> -> vector<16x64xf32>
    %c1_134 = arith.constant 1 : index
    %c0_135 = arith.constant 0 : index
    %c0_136 = arith.constant 0 : index
    %329 = vector.load %arg11[%c1_134, %c0_135, %c0_136] : memref<2x1x64xf32, #tpu.memory_space<vmem>>, vector<1x1x64xf32>
    %330 = vector.shape_cast %329 : vector<1x1x64xf32> to vector<1x64xf32>
    %331 = vector.broadcast %330 : vector<1x64xf32> to vector<16x64xf32>
    %332 = arith.addf %328, %331 : vector<16x64xf32>
    %cst_137 = arith.constant 0.000000e+00 : f32
    %333 = vector.broadcast %cst_137 : f32 to vector<16x64xf32>
    %334 = arith.maximumf %332, %333 : vector<16x64xf32>
    %c1_138 = arith.constant 1 : index
    %c0_139 = arith.constant 0 : index
    %c0_140 = arith.constant 0 : index
    %335 = vector.load %arg12[%c1_138, %c0_139, %c0_140] : memref<2x64x32xf32, #tpu.memory_space<vmem>>, vector<1x64x32xf32>
    %336 = vector.shape_cast %335 : vector<1x64x32xf32> to vector<64x32xf32>
    %cst_141 = arith.constant dense<0.000000e+00> : vector<16x32xf32>
    %337 = tpu.matmul %334, %336, %cst_141 {dimension_numbers = #tpu.dot_dimension_numbers<[1], [0], [0], [1], [0, 0, 1, 1], [], []>} : vector<16x64xf32>, vector<64x32xf32>, vector<16x32xf32> -> vector<16x32xf32>
    %c1_142 = arith.constant 1 : index
    %c0_143 = arith.constant 0 : index
    %c0_144 = arith.constant 0 : index
    %338 = vector.load %arg13[%c1_142, %c0_143, %c0_144] : memref<2x1x32xf32, #tpu.memory_space<vmem>>, vector<1x1x32xf32>
    %339 = vector.shape_cast %338 : vector<1x1x32xf32> to vector<1x32xf32>
    %340 = vector.broadcast %339 : vector<1x32xf32> to vector<16x32xf32>
    %341 = arith.addf %337, %340 : vector<16x32xf32>
    %342 = arith.addf %325, %341 : vector<16x32xf32>
    %cst_145 = arith.constant dense<0.000000e+00> : vector<16xf32>
    %343 = vector.multi_reduction <add>, %342, %cst_145 [1] : vector<16x32xf32> to vector<16xf32>
    %344 = vector.shape_cast %343 : vector<16xf32> to vector<16x1xf32>
    %cst_146 = arith.constant 3.200000e+01 : f32
    %345 = vector.broadcast %cst_146 : f32 to vector<16x1xf32>
    %346 = arith.divf %344, %345 : vector<16x1xf32>
    %347 = vector.broadcast %346 : vector<16x1xf32> to vector<16x32xf32>
    %348 = arith.subf %342, %347 : vector<16x32xf32>
    %349 = arith.mulf %348, %348 : vector<16x32xf32>
    %cst_147 = arith.constant dense<0.000000e+00> : vector<16xf32>
    %350 = vector.multi_reduction <add>, %349, %cst_147 [1] : vector<16x32xf32> to vector<16xf32>
    %351 = vector.shape_cast %350 : vector<16xf32> to vector<16x1xf32>
    %cst_148 = arith.constant 3.200000e+01 : f32
    %352 = vector.broadcast %cst_148 : f32 to vector<16x1xf32>
    %353 = arith.divf %351, %352 : vector<16x1xf32>
    %354 = vector.broadcast %346 : vector<16x1xf32> to vector<16x32xf32>
    %355 = arith.subf %342, %354 : vector<16x32xf32>
    %cst_149 = arith.constant 9.99999974E-6 : f32
    %356 = vector.broadcast %cst_149 : f32 to vector<16x1xf32>
    %357 = arith.addf %353, %356 : vector<16x1xf32>
    %358 = math.rsqrt %357 : vector<16x1xf32>
    %359 = vector.broadcast %358 : vector<16x1xf32> to vector<16x32xf32>
    %360 = arith.mulf %355, %359 : vector<16x32xf32>
    %c1_150 = arith.constant 1 : index
    %c0_151 = arith.constant 0 : index
    %c0_152 = arith.constant 0 : index
    %361 = vector.load %arg14[%c1_150, %c0_151, %c0_152] : memref<2x1x32xf32, #tpu.memory_space<vmem>>, vector<1x1x32xf32>
    %362 = vector.shape_cast %361 : vector<1x1x32xf32> to vector<1x32xf32>
    %363 = vector.broadcast %362 : vector<1x32xf32> to vector<16x32xf32>
    %364 = arith.mulf %360, %363 : vector<16x32xf32>
    %c1_153 = arith.constant 1 : index
    %c0_154 = arith.constant 0 : index
    %c0_155 = arith.constant 0 : index
    %365 = vector.load %arg15[%c1_153, %c0_154, %c0_155] : memref<2x1x32xf32, #tpu.memory_space<vmem>>, vector<1x1x32xf32>
    %366 = vector.shape_cast %365 : vector<1x1x32xf32> to vector<1x32xf32>
    %367 = vector.broadcast %366 : vector<1x32xf32> to vector<16x32xf32>
    %368 = arith.addf %364, %367 : vector<16x32xf32>
    %369 = vector.broadcast %25 : vector<16x1xf32> to vector<16x32xf32>
    %370 = arith.mulf %368, %369 : vector<16x32xf32>
    %371 = vector.shape_cast %370 : vector<16x32xf32> to vector<2x8x32xf32>
    %cst_156 = arith.constant dense<0.000000e+00> : vector<2x32xf32>
    %372 = vector.multi_reduction <add>, %371, %cst_156 [1] : vector<2x8x32xf32> to vector<2x32xf32>
    %373 = vector.broadcast %32 : vector<2x1xf32> to vector<2x32xf32>
    %374 = arith.divf %372, %373 : vector<2x32xf32>
    %c0_157 = arith.constant 0 : index
    %c0_158 = arith.constant 0 : index
    %375 = vector.load %arg16[%c0_157, %c0_158] : memref<32x5xf32, #tpu.memory_space<vmem>>, vector<32x5xf32>
    %cst_159 = arith.constant dense<0.000000e+00> : vector<2x5xf32>
    %376 = tpu.matmul %374, %375, %cst_159 {dimension_numbers = #tpu.dot_dimension_numbers<[1], [0], [0], [1], [0, 0, 1, 1], [], []>} : vector<2x32xf32>, vector<32x5xf32>, vector<2x5xf32> -> vector<2x5xf32>
    %c0_160 = arith.constant 0 : index
    %c0_161 = arith.constant 0 : index
    %377 = vector.load %arg17[%c0_160, %c0_161] : memref<1x5xf32, #tpu.memory_space<vmem>>, vector<1x5xf32>
    %378 = vector.broadcast %377 : vector<1x5xf32> to vector<2x5xf32>
    %379 = arith.addf %376, %378 : vector<2x5xf32>
    %c0_162 = arith.constant 0 : index
    %c0_163 = arith.constant 0 : index
    %380 = vector.load %arg18[%c0_162, %c0_163] : memref<2x5xf32, #tpu.memory_space<vmem>>, vector<2x5xf32>
    tpu.vector_store %arg18[%c0_162, %c0_163], %379 {strides = array<i32>} : memref<2x5xf32, #tpu.memory_space<vmem>>, vector<2x5xf32>,
    return
  }
}

</mosaic_0001>

<bundles_post_ra>
// kernel: tpu_custom_call.1
= control target key start
LH: loop header
LB: loop body
LE: loop exit
PB: predicated region body
PF: predicated region fallthrough
CT: control target
= control target key end

     0   :  { %s5584_s0 = inlined_call_operand.vmem [shape: s32[16,1], index: 0, kind: input, shape index: {}]   ;;  %s5585_s1 = inlined_call_operand.vmem [shape: s32[2,1,8], index: 1, kind: input, shape index: {}]   ;;  %s5586_s2 = inlined_call_operand.vmem [shape: f32[50,32], index: 2, kind: input, shape index: {}]   ;;  %s5587_s3 = inlined_call_operand.vmem [shape: f32[8,32], index: 3, kind: input, shape index: {}]   ;;  %s5588_s4 = inlined_call_operand.vmem [shape: f32[2,32,96], index: 4, kind: input, shape index: {}]   ;;  %s5589_s5 = inlined_call_operand.vmem [shape: f32[2,1,96], index: 5, kind: input, shape index: {}]   ;;  %s5590_s6 = inlined_call_operand.vmem [shape: f32[2,32,32], index: 6, kind: input, shape index: {}]   ;;  %s5591_s7 = inlined_call_operand.vmem [shape: f32[2,1,32], index: 7, kind: input, shape index: {}]   ;;  %s5592_s8 = inlined_call_operand.vmem [shape: f32[2,1,32], index: 8, kind: input, shape index: {}]   ;;  %s5593_s9 = inlined_call_operand.vmem [shape: f32[2,1,32], index: 9, kind: input, shape index: {}]   ;;  %s5594_s10 = inlined_call_operand.vmem [shape: f32[2,32,64], index: 10, kind: input, shape index: {}]   ;;  %s5595_s11 = inlined_call_operand.vmem [shape: f32[2,1,64], index: 11, kind: input, shape index: {}]   ;;  %s5596_s12 = inlined_call_operand.vmem [shape: f32[2,64,32], index: 12, kind: input, shape index: {}]   ;;  %s5597_s13 = inlined_call_operand.vmem [shape: f32[2,1,32], index: 13, kind: input, shape index: {}]   ;;  %s5598_s14 = inlined_call_operand.vmem [shape: f32[2,1,32], index: 14, kind: input, shape index: {}]   ;;  %s5599_s15 = inlined_call_operand.vmem [shape: f32[2,1,32], index: 15, kind: input, shape index: {}]   ;;  %s5600_s16 = inlined_call_operand.vmem [shape: f32[32,5], index: 16, kind: input, shape index: {}]   ;;  %s5601_s17 = inlined_call_operand.vmem [shape: f32[1,5], index: 17, kind: input, shape index: {}]   ;;  %s5602_s18 = inlined_call_operand.hbm [shape: f32[2,5], index: 18, kind: output, shape index: {}]  }
   0x1   :  { %5624 = sst [smem:[#allocation5_spill]] %s5584_s0 }
   0x2   :  { %5625 = sst [smem:[#allocation6_spill]] %s5585_s1 }
   0x3   :  { %5626 = sst [smem:[#allocation7_spill]] %s5586_s2 }
   0x4   :  { %s5627_s29 = sld [smem:[#allocation5_spill]]  ;;  %s5628_s20 = sld [smem:[#allocation7_spill]]  ;;  %v4811_v3 = vmov 0   ;;  %v4812_v7 = vmov 0.0  }
   0x5   :  { %4694 = vset.pattern.permute.xlu0 %v4811_v3  ;;  %4695 = vset.pattern.permute.xlu1 %v4811_v3 }
   0xa   :  { %v60_v0 = vld [vmem:[%s5627_s29] sm:$0xff]  ;;  %v61_v1 = vld [vmem:[%s5627_s29 + $0x8] sm:$0xff]  ;;  %v78_v5 = vld [vmem:[%s5628_s20 + $0x10] sm:$0xff] }
   0xb   :  { %v76_v2 = vld [vmem:[%s5628_s20] sm:$0xff]  ;;  %vm180_vm0 = vcmp.ne.s32.totalorder %v60_v0, 0  ;;  %vm181_vm1 = vcmp.ne.s32.totalorder %v61_v1, 0  ;;  %v77_v4 = vld [vmem:[%s5628_s20 + $0x8] sm:$0xff]  ;;  %v79_v6 = vld [vmem:[%s5628_s20 + $0x18] sm:$0xff]  ;;  %65 = vperm.xlu0 %4694, %v60_v0  }
   0xc   :  { %v4944_v8 = vsel %vm180_vm0, 1.0, %v4812_v7  ;;  %v4947_v9 = vsel %vm181_vm1, 1.0, %v4812_v7  ;;  %v4577_v10 = vpack.c.bf16 %v77_v4, %v76_v2  ;;  %v4581_v11 = vpack.c.bf16 %v79_v6, %v78_v5 }
   0xd   :  { %23 = vsyncpa [#allocation3], 0  ;;  %v4696_v12 = vpack.i.bf16 %v4947_v9, %v4944_v8  ;;  %v80_v13 = vld [vmem:[%s5628_s20 + $0x20] sm:$0xff]  ;;  %v81_v14 = vld [vmem:[%s5628_s20 + $0x28] sm:$0xff]  ;;  %vm90_vm2 = vcmask 1041408   ;;  %v62_v20 = vlaneseq  ;;  %vm83_vm3 = vcmask 408576  }
   0xe   :  { %4578 = vmatprep.subr.bf16.mxu0 %v4577_v10  ;;  %v4585_v15 = vpack.c.bf16 %v81_v14, %v80_v13  ;;  %v201_v16 = vld [vmem:[%s5588_s4] sm:$0xff]  ;;  %v202_v17 = vld [vmem:[%s5588_s4 + $0x8] sm:$0xff]  ;;  %v82_v19 = vld [vmem:[%s5628_s20 + $0x30] sm:$0x3]  ;;  %vm212_vm6 = vcmask 261120   ;;  %vm4813_vm7 = vmmov 0  }
   0xf   :  { %4580 = vmatpush3.bf16.msra.mxu0 %v4577_v10  ;;  %68 = vperm.xlu0 %4694, %v61_v1   ;;  %v4589_v18 = vpack.c.bf16 %v202_v17, %v201_v16  ;;  %v63_v21 = vand.u32 127, %v62_v20  ;;  %v203_v26 = vld [vmem:[%s5588_s4 + $0x10] sm:$0xff]  ;;  %v204_v27 = vld [vmem:[%s5588_s4 + $0x18] sm:$0xff]  ;;  %v171_v31 = vld [vmem:[%s5587_s3] sm:$0xff]  ;;  %s4814_s28 = smov 96   ;;  %vm297_vm8 = vcmask 64512  }
  0x10   :  { %4582 = vmatprep.subr.bf16.mxu0 %v4581_v11  ;;  %v4593_v28 = vpack.c.bf16 %v204_v27, %v203_v26  ;;  %v4041_v36 = vld [vmem:[%s5589_s5] ss:$0 sm:$0xff]  ;;  %s5629_s0 = sld [smem:[#allocation6_spill]]  ;;  %v454_v44 = vshrl.u32 %v62_v20, 7  ;;  %s4815_s21 = smov 64   ;;  %vm1670_vm11 = vcmask 195584  }
  0x11   :  { %4590 = vmatprep.subr.bf16.mxu1 %v4589_v18  ;;  %s4816_s22 = smov 88   ;;  %s4817_s20 = smov 120   ;;  %vm1667_vm12 = vcmask 130048   ;;  %vm1921_vm13 = vcmask 523264   ;;  %vm192_vm15 = vcmask 57344   ;;  %v3932_v8 = vld [vmem:[%s5600_s16 + $0x18] sm:$0xff] }
  0x12   :  { %4592 = vmatpush3.bf16.msra.mxu1 %v4589_v18  ;;  %v5020_v46 = vsub.s32 0, %v454_v44  ;;  %s4818_s2 = smov 56   ;;  %s5622_s23 = smov 80   ;;  %vm3942_vm1 = vcmask 1041409  }
  0x13   :  { %4584 = vmatpush3.bf16.msra.mxu0 %v4581_v11  ;;  %4594 = vmatprep.subr.bf16.mxu1 %v4593_v28  ;;  %s5620_s24 = smov 112   ;;  %s5616_s25 = smov 48  }
  0x14   :  { %4586 = vmatprep.subr.bf16.mxu0 %v4585_v15  ;;  %s5614_s26 = smov 72   ;;  %s5612_s3 = smov 104  }
  0x15   :  { %s5610_s27 = smov 40   ;;  %s5606_s29 = smov 8  }
  0x16   :  { %4596 = vmatpush3.bf16.msra.mxu1 %v4593_v28  ;;  %v174_v43 = vld [vmem:[%s5629_s0] sm:$0x1]  ;;  %v175_v45 = vld [vmem:[%s5629_s0 + $0x1] sm:$0x1]  ;;  %s5608_s30 = smov 16   ;;  %s5618_s19 = smov 24  }
  0x17   :  { %4588 = vmatpush3.bf16.msra.mxu0 %v4585_v15  ;;  %4313 = vmatprep.subr.mxu1 %v4812_v7  ;;  %vm176_vm9 = vcmp.eq.s32.totalorder %v174_v43, 0  ;;  %vm177_vm10 = vcmp.eq.s32.totalorder %v175_v45, 0  ;;  %s5638_s1 = smov 24  }
  0x18   :  { %4297 = vmatprep.subr.msk.mxu0 %vm90_vm2, %v82_v19  ;;  %v178_v47 = vsel %vm176_vm9, -1e+09, %v4812_v7  ;;  %v179_v49 = vsel %vm177_vm10, -1e+09, %v4812_v7 }
  0x19   :  { %v5024_v48 = vrot.slane %v178_v47, %v5020_v46  ;;  %v5028_v53 = vrot.slane %v179_v49, %v5020_v46 }
  0x1b   :  { %4298 = vmatpush3.msk.msra.mxu0 %vm90_vm2, %v82_v19  ;;  %vm4016_vm2 = vcmask 33792  }
  0x1c   :  { %4333 = vmatprep.subr.mxu0 %v4812_v7 }
  0x8a   :  { %v66_v22 = vpop.permute.xlu0 %65 }
  0x8b   :  { %vm70_vm4 = vcmp.eq.s32.totalorder %v66_v22, %v63_v21 }
  0x8c   :  { %v4032_v23 = vsel %vm70_vm4, 1.0, %v4812_v7 }
  0x8d   :  { %4299 = vmatprep.mubr.msk.f32.mxu0 %vm83_vm3, %v4032_v23 }
  0x8e   :  { %v69_v24 = vpop.permute.xlu0 %68 }
  0x8f   :  { %vm71_vm5 = vcmp.eq.s32.totalorder %v69_v24, %v63_v21 }
  0x90   :  { %v4033_v25 = vsel %vm71_vm5, 1.0, %v4812_v7 }
  0x91   :  { %4300 = vmatmul.mubr.msk.f32.vlgmr.msra.gmra.mrb[0].mxu0 %vm83_vm3, %v4033_v25 }
  0x92   :  { %4335 = vmatprep.mubr.msk.f32.mxu0 %vm4813_vm7, %v4812_v7 }
 0x164   :  { %v4301_v29 = vpop.f32.mrb[0].mxu0 }
 0x165   :  { %v170_v30 = vmul.f32 5.656854, %v4301_v29  ;;  %v160_v32 = vpop.f32.mrb[1].mxu0 }
 0x166   :  { %v169_v33 = vmul.f32 5.656854, %v160_v32 }
 0x167   :  { %v4981_v35 = vadd.f32 %v171_v31, %v170_v30 }
 0x168   :  { %v4979_v34 = vadd.f32 %v171_v31, %v169_v33 }
 0x16a   :  { %4310 = vmatprep.mubr.msk.f32.mxu1 %vm212_vm6, %v4979_v34 }
 0x16b   :  { %4311 = vmatmul.mubr.msk.f32.vlgmr.msra.gmra.mrb[0].mxu1 %vm212_vm6, %v4981_v35 }
 0x16c   :  { %4315 = vmatprep.mubr.msk.f32.mxu1 %vm4813_vm7, %v4812_v7 }
 0x23e   :  { %v4312_v37 = vpop.f32.mrb[0].mxu1 }
 0x23f   :  { %v285_v38 = vpop.f32.mrb[1].mxu1  ;;  %v4998_v40 = vadd.f32 %v4312_v37, %v4041_v36 }
 0x240   :  { %v4994_v39 = vadd.f32 %v4041_v36, %v285_v38 }
 0x242   :  { %295 = vrot.lane.b32.xlu1 %v4994_v39, %s4814_s28 }
 0x246   :  { %373 = vrot.lane.b32.xlu1 %v4998_v40, %s4814_s28 }
 0x2b4   :  { %v296_v41 = vpop.permute.xlu1 %295 }
 0x2b5   :  { %4314 = vmatpush3.xpose.msk.msra.mxu1 %vm297_vm8, %v296_v41 }
 0x2b6   :  { %4318 = vmatprep.subr.mxu1 %v4812_v7 }
 0x2b8   :  { %4316 = vmatmul.mubr.msk.f32.vlgmr.msra.gmra.mrb[2].mxu1 %vm297_vm8, %v4994_v39  ;;  %v374_v42 = vpop.permute.xlu1 %373 }
 0x2b9   :  { %4319 = vmatpush3.xpose.msk.msra.mxu1 %vm297_vm8, %v374_v42  ;;  %4320 = vmatprep.mubr.msk.f32.mxu1 %vm4813_vm7, %v4812_v7 }
 0x2ba   :  { %4323 = vmatprep.subr.mxu1 %v4812_v7 }
 0x2bc   :  { %4321 = vmatmul.mubr.msk.f32.vlgmr.msra.gmra.mrb[4].mxu1 %vm297_vm8, %v4998_v40 }
 0x2bd   :  { %4325 = vmatprep.mubr.msk.f32.mxu1 %vm4813_vm7, %v4812_v7 }
 0x38b   :  { %v368_v50 = vpop.f32.mrb[2].mxu1 }
 0x38c   :  { %v449_v51 = vmul.f32 0.35355338, %v368_v50  ;;  %v4317_v52 = vpop.f32.mrb[3].mxu1 }
 0x38e   :  { %v463_v54 = vadd.f32 %v5024_v48, %v449_v51 }
 0x38f   :  { %v445_v55 = vpop.f32.mrb[4].mxu1 }
 0x390   :  { %v450_v56 = vmul.f32 0.35355338, %v445_v55  ;;  %v4322_v57 = vpop.f32.mrb[5].mxu1  ;;  %v465_v58 = vsel %vm297_vm8, %v463_v54, -inf }
 0x391   :  { %466 = vmax.xlane.f32.xlu0 %v465_v58 }
 0x392   :  { %v464_v59 = vadd.f32 %v5028_v53, %v450_v56 }
 0x394   :  { %v468_v60 = vsel %vm297_vm8, %v464_v59, -inf }
 0x395   :  { %469 = vmax.xlane.f32.xlu1 %v468_v60 }
 0x3a6   :  { %487 = vrot.lane.b32.xlu1 %v4994_v39, %s4815_s21 }
 0x3aa   :  { %641 = vrot.lane.b32.xlu1 %v4994_v39, %s4816_s22 }
 0x3ae   :  { %719 = vrot.lane.b32.xlu1 %v4998_v40, %s4816_s22 }
 0x3b2   :  { %717 = vrot.lane.b32.xlu1 %v4998_v40, %s4817_s20 }
 0x41e   :  { %v467_v61 = vpop.xlane.xlu0 %466 }
 0x41f   :  { %v471_v62 = vsub.f32 %v463_v54, %v467_v61 }
 0x421   :  { %v473_v63 = vmul.f32 1.442695, %v471_v62 }
 0x422   :  { %v470_v0 = vpop.xlane.xlu1 %469 }
 0x423   :  { %4701 = vpow2.f32 %v473_v63  ;;  %v472_v5 = vsub.f32 %v464_v59, %v470_v0 }
 0x425   :  { %v475_v6 = vmul.f32 1.442695, %v472_v5 }
 0x426   :  { %v488_v1 = vpop.permute.xlu1 %487 }
 0x427   :  { %4324 = vmatpush3.msra.mxu1 %v488_v1  ;;  %4703 = vpow2.f32 %v475_v6 }
 0x428   :  { %4328 = vmatprep.subr.mxu1 %v4812_v7 }
 0x42a   :  { %v642_v2 = vpop.permute.xlu1 %641 }
 0x42b   :  { %4334 = vmatpush3.xpose.msk.msra.mxu0 %vm297_vm8, %v642_v2 }
 0x42c   :  { %4343 = vmatprep.subr.mxu0 %v4812_v7 }
 0x42d   :  { %v4702_v3 = vpop.eup %4701 }
 0x42e   :  { %v477_v4 = vsel %vm297_vm8, %v4702_v3, 0.0  ;;  %v720_v20 = vpop.permute.xlu1 %719 }
 0x42f   :  { %478 = vadd.xlane.f32.xlu0 %v477_v4 }
 0x431   :  { %v4704_v10 = vpop.eup %4703 }
 0x432   :  { %v480_v11 = vsel %vm297_vm8, %v4704_v10, 0.0  ;;  %v718_v22 = vpop.permute.xlu1 %717 }
 0x445   :  { %563 = vrot.lane.b32.xlu0 %v4998_v40, %s4815_s21 }
 0x464   :  { %481 = vadd.xlane.f32.xlu0 %v480_v11 }
 0x47a   :  { %639 = vrot.lane.b32.xlu0 %v4994_v39, %s4817_s20 }
 0x4bc   :  { %v479_v13 = vpop.xlane.xlu0 %478 }
 0x4bd   :  { %4705 = vrcp.f32 %v479_v13 }
 0x4c0   :  { %v564_v16 = vpop.permute.xlu0 %563 }
 0x4c7   :  { %v4706_v14 = vpop.eup %4705 }
 0x4c8   :  { %v485_v15 = vmul.f32 %v4706_v14, %v4702_v3 }
 0x4ca   :  { %4326 = vmatmul.mubr.msk.f32.vlgmr.msra.gmra.mrb[6].mxu1 %vm297_vm8, %v485_v15 }
 0x4cb   :  { %4329 = vmatpush3.msra.mxu1 %v564_v16  ;;  %4330 = vmatprep.mubr.msk.f32.mxu1 %vm4813_vm7, %v4812_v7 }
 0x4cc   :  { %4338 = vmatprep.subr.mxu1 %v4812_v7 }
 0x4f1   :  { %v482_v17 = vpop.xlane.xlu0 %481 }
 0x4f2   :  { %4707 = vrcp.f32 %v482_v17 }
 0x4f5   :  { %v640_v18 = vpop.permute.xlu0 %639 }
 0x4f6   :  { %4336 = vmatmul.mubr.msk.f32.vlgmr.msra.gmra.mrb[2].mxu0 %vm297_vm8, %v640_v18 }
 0x4f7   :  { %4345 = vmatprep.mubr.msk.f32.mxu0 %vm4813_vm7, %v4812_v7 }
 0x4fc   :  { %v4708_v19 = vpop.eup %4707 }
 0x4fd   :  { %v486_v21 = vmul.f32 %v4708_v19, %v4704_v10 }
 0x4ff   :  { %4331 = vmatmul.mubr.msk.f32.vlgmr.msra.gmra.mrb[8].mxu1 %vm297_vm8, %v486_v21 }
 0x500   :  { %4339 = vmatpush3.xpose.msk.msra.mxu1 %vm297_vm8, %v720_v20  ;;  %4340 = vmatprep.mubr.msk.f32.mxu1 %vm4813_vm7, %v4812_v7 }
 0x501   :  { %4348 = vmatprep.subr.mxu1 %v4812_v7 }
 0x503   :  { %4341 = vmatmul.mubr.msk.f32.vlgmr.msra.gmra.mrb[10].mxu1 %vm297_vm8, %v718_v22 }
 0x504   :  { %4350 = vmatprep.mubr.msk.f32.mxu1 %vm4813_vm7, %v4812_v7 }
 0x59d   :  { %v5066_v23 = vpop.f32.mrb[6].mxu1 }
 0x59e   :  { %v4327_v24 = vpop.f32.mrb[7].mxu1 }
 0x5c9   :  { %v713_v25 = vpop.f32.mrb[2].mxu0 }
 0x5ca   :  { %v795_v26 = vmul.f32 0.35355338, %v713_v25  ;;  %v4337_v27 = vpop.f32.mrb[3].mxu0 }
 0x5cc   :  { %v797_v28 = vadd.f32 %v795_v26, %v5024_v48 }
 0x5ce   :  { %v799_v29 = vsel %vm297_vm8, %v797_v28, -inf }
 0x5cf   :  { %800 = vmax.xlane.f32.xlu0 %v799_v29 }
 0x5d2   :  { %v5070_v30 = vpop.f32.mrb[8].mxu1 }
 0x5d3   :  { %v4332_v31 = vpop.f32.mrb[9].mxu1 }
 0x5d6   :  { %v791_v32 = vpop.f32.mrb[10].mxu1 }
 0x5d7   :  { %v796_v33 = vmul.f32 0.35355338, %v791_v32  ;;  %v4342_v36 = vpop.f32.mrb[11].mxu1 }
 0x5d9   :  { %v798_v37 = vadd.f32 %v796_v33, %v5028_v53 }
 0x5db   :  { %v802_v38 = vsel %vm297_vm8, %v798_v37, -inf }
 0x5dc   :  { %803 = vmax.xlane.f32.xlu1 %v802_v38 }
 0x5ed   :  { %821 = vrot.lane.b32.xlu1 %v4994_v39, %s4818_s2 }
 0x5f1   :  { %975 = vrot.lane.b32.xlu1 %v4994_v39, %s5622_s23 }
 0x5f5   :  { %1053 = vrot.lane.b32.xlu1 %v4998_v40, %s5622_s23 }
 0x5f9   :  { %1051 = vrot.lane.b32.xlu1 %v4998_v40, %s5620_s24 }
 0x65c   :  { %v801_v41 = vpop.xlane.xlu0 %800 }
 0x65d   :  { %v805_v42 = vsub.f32 %v797_v28, %v801_v41 }
 0x65f   :  { %v807_v43 = vmul.f32 1.442695, %v805_v42 }
 0x661   :  { %4709 = vpow2.f32 %v807_v43 }
 0x669   :  { %v804_v44 = vpop.xlane.xlu1 %803 }
 0x66a   :  { %v806_v50 = vsub.f32 %v798_v37, %v804_v44 }
 0x66b   :  { %v4710_v45 = vpop.eup %4709 }
 0x66c   :  { %v811_v47 = vsel %vm297_vm8, %v4710_v45, 0.0  ;;  %v809_v51 = vmul.f32 1.442695, %v806_v50 }
 0x66d   :  { %812 = vadd.xlane.f32.xlu0 %v811_v47  ;;  %v822_v49 = vpop.permute.xlu1 %821 }
 0x66e   :  { %4344 = vmatpush3.msra.mxu0 %v822_v49  ;;  %4711 = vpow2.f32 %v809_v51 }
 0x66f   :  { %4353 = vmatprep.subr.mxu0 %v4812_v7 }
 0x671   :  { %v976_v59 = vpop.permute.xlu1 %975 }
 0x675   :  { %v1054_v63 = vpop.permute.xlu1 %1053 }
 0x678   :  { %v4712_v52 = vpop.eup %4711 }
 0x679   :  { %v814_v54 = vsel %vm297_vm8, %v4712_v52, 0.0  ;;  %v1052_v1 = vpop.permute.xlu1 %1051 }
 0x683   :  { %897 = vrot.lane.b32.xlu0 %v4998_v40, %s4818_s2 }
 0x6a2   :  { %815 = vadd.xlane.f32.xlu0 %v814_v54 }
 0x6b8   :  { %973 = vrot.lane.b32.xlu0 %v4994_v39, %s5620_s24 }
 0x6fa   :  { %v813_v55 = vpop.xlane.xlu0 %812 }
 0x6fb   :  { %4713 = vrcp.f32 %v813_v55 }
 0x6fe   :  { %v898_v56 = vpop.permute.xlu0 %897 }
 0x6ff   :  { %4349 = vmatpush3.msra.mxu1 %v898_v56 }
 0x700   :  { %4358 = vmatprep.subr.mxu1 %v4812_v7 }
 0x705   :  { %v4714_v57 = vpop.eup %4713 }
 0x706   :  { %v819_v58 = vmul.f32 %v4714_v57, %v4710_v45 }
 0x708   :  { %4346 = vmatmul.mubr.msk.f32.vlgmr.msra.gmra.mrb[4].mxu0 %vm297_vm8, %v819_v58 }
 0x709   :  { %4354 = vmatpush3.xpose.msk.msra.mxu0 %vm297_vm8, %v976_v59  ;;  %4355 = vmatprep.mubr.msk.f32.mxu0 %vm4813_vm7, %v4812_v7 }
 0x70a   :  { %4363 = vmatprep.subr.mxu0 %v4812_v7 }
 0x72f   :  { %v816_v60 = vpop.xlane.xlu0 %815 }
 0x730   :  { %4715 = vrcp.f32 %v816_v60 }
 0x733   :  { %v974_v61 = vpop.permute.xlu0 %973 }
 0x734   :  { %4356 = vmatmul.mubr.msk.f32.vlgmr.msra.gmra.mrb[6].mxu0 %vm297_vm8, %v974_v61 }
 0x735   :  { %4365 = vmatprep.mubr.msk.f32.mxu0 %vm4813_vm7, %v4812_v7 }
 0x73a   :  { %v4716_v62 = vpop.eup %4715 }
 0x73b   :  { %v820_v0 = vmul.f32 %v4716_v62, %v4712_v52 }
 0x73d   :  { %4351 = vmatmul.mubr.msk.f32.vlgmr.msra.gmra.mrb[12].mxu1 %vm297_vm8, %v820_v0 }
 0x73e   :  { %4359 = vmatpush3.xpose.msk.msra.mxu1 %vm297_vm8, %v1054_v63  ;;  %4360 = vmatprep.mubr.msk.f32.mxu1 %vm4813_vm7, %v4812_v7 }
 0x73f   :  { %4368 = vmatprep.subr.mxu1 %v4812_v7 }
 0x741   :  { %4361 = vmatmul.mubr.msk.f32.vlgmr.msra.gmra.mrb[14].mxu1 %vm297_vm8, %v1052_v1 }
 0x742   :  { %4370 = vmatprep.mubr.msk.f32.mxu1 %vm4813_vm7, %v4812_v7 }
 0x7db   :  { %v5106_v2 = vpop.f32.mrb[4].mxu0 }
 0x7dc   :  { %v4347_v3 = vpop.f32.mrb[5].mxu0 }
 0x807   :  { %v1047_v4 = vpop.f32.mrb[6].mxu0 }
 0x808   :  { %v1129_v5 = vmul.f32 0.35355338, %v1047_v4  ;;  %v4357_v6 = vpop.f32.mrb[7].mxu0 }
 0x80a   :  { %v1131_v10 = vadd.f32 %v1129_v5, %v5024_v48 }
 0x80c   :  { %v1133_v11 = vsel %vm297_vm8, %v1131_v10, -inf }
 0x80d   :  { %1134 = vmax.xlane.f32.xlu0 %v1133_v11 }
 0x810   :  { %v5110_v13 = vpop.f32.mrb[12].mxu1 }
 0x811   :  { %v4352_v14 = vpop.f32.mrb[13].mxu1 }
 0x814   :  { %v1125_v15 = vpop.f32.mrb[14].mxu1 }
 0x815   :  { %v1130_v16 = vmul.f32 0.35355338, %v1125_v15  ;;  %v4362_v17 = vpop.f32.mrb[15].mxu1 }
 0x817   :  { %v1132_v18 = vadd.f32 %v1130_v16, %v5028_v53 }
 0x819   :  { %v1136_v19 = vsel %vm297_vm8, %v1132_v18, -inf }
 0x81a   :  { %1137 = vmax.xlane.f32.xlu1 %v1136_v19 }
 0x82b   :  { %1155 = vrot.lane.b32.xlu1 %v4994_v39, %s5616_s25 }
 0x82f   :  { %1309 = vrot.lane.b32.xlu1 %v4994_v39, %s5614_s26 }
 0x833   :  { %1387 = vrot.lane.b32.xlu1 %v4998_v40, %s5614_s26 }
 0x837   :  { %1385 = vrot.lane.b32.xlu1 %v4998_v40, %s5612_s3 }
 0x89a   :  { %v1135_v20 = vpop.xlane.xlu0 %1134 }
 0x89b   :  { %v1139_v21 = vsub.f32 %v1131_v10, %v1135_v20 }
 0x89d   :  { %v1141_v22 = vmul.f32 1.442695, %v1139_v21 }
 0x89f   :  { %4717 = vpow2.f32 %v1141_v22  ;;  %v1674_v22 = vld [vmem:[%s5590_s6 + $0x8] sm:$0xff] }
 0x8a7   :  { %v1138_v24 = vpop.xlane.xlu1 %1137 }
 0x8a8   :  { %v1140_v28 = vsub.f32 %v1132_v18, %v1138_v24  ;;  %v1675_v24 = vld [vmem:[%s5590_s6 + $0x10] sm:$0xff] }
 0x8a9   :  { %v4718_v25 = vpop.eup %4717 }
 0x8aa   :  { %v1145_v26 = vsel %vm297_vm8, %v4718_v25, 0.0  ;;  %v1143_v29 = vmul.f32 1.442695, %v1140_v28 }
 0x8ab   :  { %1146 = vadd.xlane.f32.xlu0 %v1145_v26  ;;  %v1156_v27 = vpop.permute.xlu1 %1155  ;;  %v1676_v26 = vld [vmem:[%s5590_s6 + $0x18] sm:$0xff] }
 0x8ac   :  { %4364 = vmatpush3.msra.mxu0 %v1156_v27  ;;  %4719 = vpow2.f32 %v1143_v29  ;;  %v4601_v27 = vpack.c.bf16 %v1676_v26, %v1675_v24 }
 0x8ad   :  { %4373 = vmatprep.subr.mxu0 %v4812_v7 }
 0x8af   :  { %v1310_v41 = vpop.permute.xlu1 %1309 }
 0x8b3   :  { %v1388_v45 = vpop.permute.xlu1 %1387 }
 0x8b6   :  { %v4720_v31 = vpop.eup %4719 }
 0x8b7   :  { %v1148_v32 = vsel %vm297_vm8, %v4720_v31, 0.0  ;;  %v1386_v49 = vpop.permute.xlu1 %1385 }
 0x8c1   :  { %1231 = vrot.lane.b32.xlu0 %v4998_v40, %s5616_s25  ;;  %s5636_s25 = smov 8  }
 0x8e0   :  { %1149 = vadd.xlane.f32.xlu0 %v1148_v32 }
 0x8f6   :  { %1307 = vrot.lane.b32.xlu0 %v4994_v39, %s5612_s3 }
 0x938   :  { %v1147_v33 = vpop.xlane.xlu0 %1146 }
 0x939   :  { %4721 = vrcp.f32 %v1147_v33 }
 0x93c   :  { %v1232_v36 = vpop.permute.xlu0 %1231 }
 0x93d   :  { %4369 = vmatpush3.msra.mxu1 %v1232_v36 }
 0x93e   :  { %4378 = vmatprep.subr.mxu1 %v4812_v7 }
 0x943   :  { %v4722_v37 = vpop.eup %4721 }
 0x944   :  { %v1153_v38 = vmul.f32 %v4722_v37, %v4718_v25 }
 0x946   :  { %4366 = vmatmul.mubr.msk.f32.vlgmr.msra.gmra.mrb[8].mxu0 %vm297_vm8, %v1153_v38 }
 0x947   :  { %4374 = vmatpush3.xpose.msk.msra.mxu0 %vm297_vm8, %v1310_v41  ;;  %4375 = vmatprep.mubr.msk.f32.mxu0 %vm4813_vm7, %v4812_v7 }
 0x948   :  { %4383 = vmatprep.subr.mxu0 %v4812_v7 }
 0x96d   :  { %v1150_v42 = vpop.xlane.xlu0 %1149 }
 0x96e   :  { %4723 = vrcp.f32 %v1150_v42 }
 0x971   :  { %v1308_v43 = vpop.permute.xlu0 %1307 }
 0x972   :  { %4376 = vmatmul.mubr.msk.f32.vlgmr.msra.gmra.mrb[10].mxu0 %vm297_vm8, %v1308_v43 }
 0x973   :  { %4385 = vmatprep.mubr.msk.f32.mxu0 %vm4813_vm7, %v4812_v7 }
 0x978   :  { %v4724_v44 = vpop.eup %4723 }
 0x979   :  { %v1154_v47 = vmul.f32 %v4724_v44, %v4720_v31 }
 0x97b   :  { %4371 = vmatmul.mubr.msk.f32.vlgmr.msra.gmra.mrb[16].mxu1 %vm297_vm8, %v1154_v47 }
 0x97c   :  { %4379 = vmatpush3.xpose.msk.msra.mxu1 %vm297_vm8, %v1388_v45  ;;  %4380 = vmatprep.mubr.msk.f32.mxu1 %vm4813_vm7, %v4812_v7 }
 0x97d   :  { %4388 = vmatprep.subr.mxu1 %v4812_v7 }
 0x97f   :  { %4381 = vmatmul.mubr.msk.f32.vlgmr.msra.gmra.mrb[18].mxu1 %vm297_vm8, %v1386_v49 }
 0x980   :  { %4390 = vmatprep.mubr.msk.f32.mxu1 %vm4813_vm7, %v4812_v7 }
 0xa19   :  { %v1227_v50 = vpop.f32.mrb[8].mxu0 }
 0xa1a   :  { %v4367_v51 = vpop.f32.mrb[9].mxu0 }
 0xa45   :  { %v1381_v52 = vpop.f32.mrb[10].mxu0 }
 0xa46   :  { %v1463_v54 = vmul.f32 0.35355338, %v1381_v52  ;;  %v4377_v55 = vpop.f32.mrb[11].mxu0 }
 0xa48   :  { %v1465_v56 = vadd.f32 %v1463_v54, %v5024_v48 }
 0xa4a   :  { %v1467_v57 = vsel %vm297_vm8, %v1465_v56, -inf }
 0xa4b   :  { %1468 = vmax.xlane.f32.xlu0 %v1467_v57 }
 0xa4e   :  { %v1303_v58 = vpop.f32.mrb[16].mxu1 }
 0xa4f   :  { %v4372_v59 = vpop.f32.mrb[17].mxu1 }
 0xa52   :  { %v1459_v60 = vpop.f32.mrb[18].mxu1 }
 0xa53   :  { %v1464_v61 = vmul.f32 0.35355338, %v1459_v60  ;;  %v4382_v62 = vpop.f32.mrb[19].mxu1 }
 0xa55   :  { %v1466_v63 = vadd.f32 %v1464_v61, %v5028_v53 }
 0xa57   :  { %v1470_v0 = vsel %vm297_vm8, %v1466_v63, -inf }
 0xa58   :  { %1471 = vmax.xlane.f32.xlu1 %v1470_v0 }
 0xa69   :  { %1489 = vrot.lane.b32.xlu1 %v4994_v39, %s5610_s27 }
 0xa6d   :  { %1643 = vrot.lane.b32.xlu1 %v5106_v2, %s5606_s29 }
 0xa71   :  { %1645 = vrot.lane.b32.xlu1 %v5110_v13, %s5606_s29 }
 0xa75   :  { %1653 = vrot.lane.b32.xlu1 %v1303_v58, %s5608_s30 }
 0xad8   :  { %v1469_v1 = vpop.xlane.xlu0 %1468 }
 0xad9   :  { %v1473_v3 = vsub.f32 %v1465_v56, %v1469_v1 }
 0xadb   :  { %v1475_v4 = vmul.f32 1.442695, %v1473_v3 }
 0xadd   :  { %4725 = vpow2.f32 %v1475_v4 }
 0xae5   :  { %v1472_v5 = vpop.xlane.xlu1 %1471 }
 0xae6   :  { %v1474_v6 = vsub.f32 %v1466_v63, %v1472_v5  ;;  %v1813_v5 = vld [vmem:[%s5594_s10 + $0x8] sm:$0xff] }
 0xae7   :  { %v4726_v10 = vpop.eup %4725 }
 0xae8   :  { %v1477_v11 = vmul.f32 1.442695, %v1474_v6  ;;  %v1479_v39 = vsel %vm297_vm8, %v4726_v10, 0.0 }
 0xae9   :  { %1480 = vadd.xlane.f32.xlu0 %v1479_v39  ;;  %v1490_v14 = vpop.permute.xlu1 %1489 }
 0xaea   :  { %4727 = vpow2.f32 %v1477_v11  ;;  %4384 = vmatpush3.msra.mxu0 %v1490_v14  ;;  %v1815_v11 = vld [vmem:[%s5594_s10 + $0x18] sm:$0xff]  ;;  %v1906_v14 = vld [vmem:[%s5596_s12] sm:$0xff] }
 0xaed   :  { %v1644_v33 = vpop.permute.xlu1 %1643 }
 0xaee   :  { %v1665_v37 = vsel %vm297_vm8, %v5066_v23, %v1644_v33  ;;  %v4068_v23 = vld [vmem:[%s5591_s7] ss:$0 sm:$0xff] }
 0xaf1   :  { %v1646_v43 = vpop.permute.xlu1 %1645 }
 0xaf2   :  { %v1666_v45 = vsel %vm297_vm8, %v5070_v30, %v1646_v43  ;;  %v1913_v43 = vld [vmem:[%s5596_s12 + $0x38] sm:$0xff] }
 0xaf4   :  { %v4728_v2 = vpop.eup %4727 }
 0xaf5   :  { %v1482_v13 = vsel %vm297_vm8, %v4728_v2, 0.0  ;;  %v1654_v44 = vpop.permute.xlu1 %1653 }
 0xaf6   :  { %1483 = vadd.xlane.f32.xlu0 %v1482_v13  ;;  %v1669_v47 = vsel %vm1667_vm12, %v1666_v45, %v1654_v44  ;;  %v1908_v13 = vld [vmem:[%s5596_s12 + $0x10] sm:$0xff]  ;;  %v4073_v45 = vld [vmem:[%s5595_s11] ss:$0 sm:$0xff] }
 0xb0c   :  { %1565 = vrot.lane.b32.xlu0 %v4998_v40, %s5610_s27  ;;  %v1673_v40 = vld [vmem:[%s5590_s6] sm:$0xff] }
 0xb0d   :  { %v4597_v25 = vpack.c.bf16 %v1674_v22, %v1673_v40 }
 0xb0f   :  { %4598 = vmatprep.subr.bf16.mxu0 %v4597_v25 }
 0xb10   :  { %1651 = vrot.lane.b32.xlu0 %v1227_v50, %s5608_s30 }
 0xb76   :  { %v1481_v15 = vpop.xlane.xlu0 %1480 }
 0xb77   :  { %4729 = vrcp.f32 %v1481_v15 }
 0xb81   :  { %v4730_v16 = vpop.eup %4729 }
 0xb82   :  { %v1487_v17 = vmul.f32 %v4730_v16, %v4726_v10  ;;  %v1814_v10 = vld [vmem:[%s5594_s10 + $0x10] sm:$0xff]  ;;  %v1909_v16 = vld [vmem:[%s5596_s12 + $0x18] sm:$0xff] }
 0xb83   :  { %v1484_v18 = vpop.xlane.xlu0 %1483  ;;  %v4609_v39 = vpack.c.bf16 %v1815_v11, %v1814_v10  ;;  %v4081_v10 = vld [vmem:[%s5588_s4 + $0x20] sm:$0xff]  ;;  %v4082_v11 = vld [vmem:[%s5588_s4 + $0x28] sm:$0xff] }
 0xb84   :  { %4731 = vrcp.f32 %v1484_v18  ;;  %4386 = vmatmul.mubr.msk.f32.vlgmr.msra.gmra.mrb[12].mxu0 %vm297_vm8, %v1487_v17  ;;  %v4617_v17 = vpack.c.bf16 %v1909_v16, %v1908_v13  ;;  %v1910_v18 = vld [vmem:[%s5596_s12 + $0x20] sm:$0xff] }
 0xb85   :  { %4600 = vmatpush3.bf16.msra.mxu0 %v4597_v25 }
 0xb86   :  { %4602 = vmatprep.subr.bf16.mxu0 %v4601_v27 }
 0xb87   :  { %v1566_v19 = vpop.permute.xlu0 %1565 }
 0xb88   :  { %4389 = vmatpush3.msra.mxu1 %v1566_v19  ;;  %v1911_v19 = vld [vmem:[%s5596_s12 + $0x28] sm:$0xff] }
 0xb89   :  { %4604 = vmatpush3.bf16.msra.mxu0 %v4601_v27 }
 0xb8b   :  { %v1652_v36 = vpop.permute.xlu0 %1651 }
 0xb8c   :  { %v1668_v38 = vsel %vm1667_vm12, %v1665_v37, %v1652_v36 }
 0xb8e   :  { %v4732_v20 = vpop.eup %4731 }
 0xb8f   :  { %v1488_v21 = vmul.f32 %v4732_v20, %v4728_v2  ;;  %v1907_v2 = vld [vmem:[%s5596_s12 + $0x8] sm:$0xff]  ;;  %v4621_v20 = vpack.c.bf16 %v1911_v19, %v1910_v18 }
 0xb90   :  { %v4613_v15 = vpack.c.bf16 %v1907_v2, %v1906_v14  ;;  %v4083_v14 = vld [vmem:[%s5588_s4 + $0x30] sm:$0xff]  ;;  %v4084_v2 = vld [vmem:[%s5588_s4 + $0x38] sm:$0xff] }
 0xb91   :  { %4391 = vmatmul.mubr.msk.f32.vlgmr.msra.gmra.mrb[20].mxu1 %vm297_vm8, %v1488_v21  ;;  %v4633_v13 = vpack.c.bf16 %v4084_v2, %v4083_v14 }
 0xb92   :  { %4614 = vmatprep.subr.bf16.mxu0 %v4613_v15 }
 0xc57   :  { %v1561_v28 = vpop.f32.mrb[12].mxu0 }
 0xc58   :  { %1659 = vrot.lane.b32.xlu0 %v1561_v28, %s5618_s19  ;;  %v4387_v29 = vpop.f32.mrb[13].mxu0  ;;  %v4071_v28 = vld [vmem:[%s5592_s8] ss:$0 sm:$0xff] }
 0xc64   :  { %v1637_v31 = vpop.f32.mrb[20].mxu1 }
 0xc65   :  { %1661 = vrot.lane.b32.xlu1 %v1637_v31, %s5618_s19  ;;  %v4392_v32 = vpop.f32.mrb[21].mxu1  ;;  %v4072_v31 = vld [vmem:[%s5593_s9] ss:$0 sm:$0xff]  ;;  %s5637_s19 = smov 16  }
 0xcca   :  { %v1660_v41 = vpop.permute.xlu0 %1659 }
 0xccb   :  { %v1671_v42 = vsel %vm1670_vm11, %v1668_v38, %v1660_v41 }
 0xccc   :  { %4401 = vmatprep.mubr.msk.f32.mxu0 %vm212_vm6, %v1671_v42  ;;  %v1912_v42 = vld [vmem:[%s5596_s12 + $0x30] sm:$0xff] }
 0xccd   :  { %v4625_v44 = vpack.c.bf16 %v1913_v43, %v1912_v42 }
 0xcd7   :  { %v1662_v49 = vpop.permute.xlu1 %1661 }
 0xcd8   :  { %v1672_v50 = vsel %vm1670_vm11, %v1669_v47, %v1662_v49 }
 0xcd9   :  { %4402 = vmatmul.mubr.msk.f32.vlgmr.msra.gmra.mrb[14].mxu0 %vm212_vm6, %v1672_v50 }
 0xcda   :  { %4616 = vmatpush3.bf16.msra.mxu0 %v4613_v15 }
 0xcdb   :  { %4618 = vmatprep.subr.bf16.mxu0 %v4617_v17 }
 0xcde   :  { %4620 = vmatpush3.bf16.msra.mxu0 %v4617_v17 }
 0xcdf   :  { %4622 = vmatprep.subr.bf16.mxu0 %v4621_v20 }
 0xce2   :  { %4624 = vmatpush3.bf16.msra.mxu0 %v4621_v20 }
 0xce3   :  { %4626 = vmatprep.subr.bf16.mxu0 %v4625_v44 }
 0xce6   :  { %4628 = vmatpush3.bf16.msra.mxu0 %v4625_v44 }
 0xce7   :  { %4455 = vmatprep.subr.mxu0 %v4812_v7 }
 0xdac   :  { %v4403_v51 = vpop.f32.mrb[14].mxu0 }
 0xdad   :  { %v1762_v52 = vadd.f32 %v4403_v51, %v4068_v23  ;;  %v1756_v54 = vpop.f32.mrb[15].mxu0 }
 0xdae   :  { %v1757_v55 = vadd.f32 %v4068_v23, %v1756_v54  ;;  %v4076_v54 = vld [vmem:[%s5597_s13] ss:$0 sm:$0xff] }
 0xdaf   :  { %v1766_v56 = vadd.f32 %v1762_v52, %v4981_v35 }
 0xdb0   :  { %v1765_v57 = vadd.f32 %v1757_v55, %v4979_v34  ;;  %v1812_v34 = vld [vmem:[%s5594_s10] sm:$0xff] }
 0xdb1   :  { %v1770_v30 = vsel %vm212_vm6, %v1766_v56, 0.0  ;;  %v4605_v6 = vpack.c.bf16 %v1813_v5, %v1812_v34 }
 0xdb2   :  { %1771 = vadd.xlane.f32.xlu1 %v1770_v30  ;;  %v1767_v58 = vsel %vm212_vm6, %v1765_v57, 0.0 }
 0xdb3   :  { %1768 = vadd.xlane.f32.xlu0 %v1767_v58  ;;  %4606 = vmatprep.subr.bf16.mxu1 %v4605_v6 }
 0xdb4   :  { %4608 = vmatpush3.bf16.msra.mxu1 %v4605_v6 }
 0xdb5   :  { %4610 = vmatprep.subr.bf16.mxu1 %v4609_v39 }
 0xdb8   :  { %4612 = vmatpush3.bf16.msra.mxu1 %v4609_v39  ;;  %v4629_v39 = vpack.c.bf16 %v4082_v11, %v4081_v10 }
 0xdba   :  { %4630 = vmatprep.subr.bf16.mxu1 %v4629_v39 }
 0xe3f   :  { %v1772_v59 = vpop.xlane.xlu1 %1771 }
 0xe40   :  { %v1775_v60 = vmul.f32 0.03125, %v1772_v59  ;;  %v1769_v61 = vpop.xlane.xlu0 %1768 }
 0xe41   :  { %v1774_v62 = vmul.f32 0.03125, %v1769_v61 }
 0xe42   :  { %v1777_v63 = vsub.f32 %v1766_v56, %v1775_v60 }
 0xe43   :  { %v1776_v0 = vsub.f32 %v1765_v57, %v1774_v62 }
 0xe44   :  { %v1779_v4 = vmul.f32 %v1777_v63, %v1777_v63 }
 0xe45   :  { %v1778_v1 = vmul.f32 %v1776_v0, %v1776_v0 }
 0xe46   :  { %v1783_v35 = vsel %vm212_vm6, %v1779_v4, 0.0 }
 0xe47   :  { %v1780_v3 = vsel %vm212_vm6, %v1778_v1, 0.0 }
 0xe48   :  { %1781 = vadd.xlane.f32.xlu0 %v1780_v3 }
 0xe4c   :  { %1784 = vadd.xlane.f32.xlu0 %v1783_v35 }
 0xed5   :  { %v1782_v21 = vpop.xlane.xlu0 %1781 }
 0xed6   :  { %v1786_v40 = vmul.f32 0.03125, %v1782_v21 }
 0xed8   :  { %v1788_v22 = vadd.f32 1e-05, %v1786_v40  ;;  %v4079_v40 = vld [vmem:[%s5598_s14] ss:$0 sm:$0xff] }
 0xed9   :  { %v1785_v24 = vpop.xlane.xlu0 %1784 }
 0xeda   :  { %4733 = vrsqrt.f32 %v1788_v22  ;;  %v1787_v25 = vmul.f32 0.03125, %v1785_v24 }
 0xedc   :  { %v1789_v26 = vadd.f32 1e-05, %v1787_v25 }
 0xede   :  { %4735 = vrsqrt.f32 %v1789_v26 }
 0xee4   :  { %v4734_v27 = vpop.eup %4733 }
 0xee5   :  { %v1792_v29 = vmul.f32 %v4734_v27, %v1776_v0  ;;  %v4080_v27 = vld [vmem:[%s5599_s15] ss:$0 sm:$0xff] }
 0xee7   :  { %v1801_v32 = vmul.f32 %v4071_v28, %v1792_v29 }
 0xee8   :  { %v4736_v33 = vpop.eup %4735 }
 0xee9   :  { %v1793_v36 = vmul.f32 %v4736_v33, %v1777_v63  ;;  %v1810_v37 = vadd.f32 %v4072_v31, %v1801_v32  ;;  %v4086_v32 = vld [vmem:[%s5589_s5 + $0x1] ss:$0 sm:$0xff]  ;;  %s5630_s5 = smov 80  }
 0xeeb   :  { %v1802_v38 = vmul.f32 %v4071_v28, %v1793_v36  ;;  %4412 = vmatprep.mubr.msk.f32.mxu1 %vm212_vm6, %v1810_v37 }
 0xeed   :  { %v1811_v41 = vadd.f32 %v4072_v31, %v1802_v38 }
 0xeef   :  { %4413 = vmatmul.mubr.msk.f32.vlgmr.msra.gmra.mrb[22].mxu1 %vm212_vm6, %v1811_v41 }
 0xef0   :  { %4632 = vmatpush3.bf16.msra.mxu1 %v4629_v39 }
 0xef1   :  { %4634 = vmatprep.subr.bf16.mxu1 %v4633_v13 }
 0xef4   :  { %4636 = vmatpush3.bf16.msra.mxu1 %v4633_v13 }
 0xef5   :  { %4445 = vmatprep.subr.mxu1 %v4812_v7 }
 0xfc2   :  { %v4414_v47 = vpop.f32.mrb[22].mxu1 }
 0xfc3   :  { %v1901_v49 = vadd.f32 %v4414_v47, %v4073_v45  ;;  %v1895_v50 = vpop.f32.mrb[23].mxu1 }
 0xfc4   :  { %v1896_v23 = vadd.f32 %v4073_v45, %v1895_v50 }
 0xfc5   :  { %v1905_v52 = vmax.f32 %v1901_v49, 0.0 }
 0xfc6   :  { %v1904_v51 = vmax.f32 %v1896_v23, 0.0 }
 0xfc8   :  { %4431 = vmatprep.mubr.msk.f32.mxu0 %vm1921_vm13, %v1904_v51 }
 0xfc9   :  { %4432 = vmatmul.mubr.msk.f32.vlgmr.msra.gmra.mrb[16].mxu0 %vm1921_vm13, %v1905_v52 }
 0xfca   :  { %4457 = vmatprep.mubr.msk.f32.mxu0 %vm4813_vm7, %v4812_v7 }
0x109c   :  { %v4433_v55 = vpop.f32.mrb[16].mxu0 }
0x109d   :  { %v2000_v56 = vadd.f32 %v4433_v55, %v4076_v54  ;;  %v1994_v57 = vpop.f32.mrb[17].mxu0 }
0x109e   :  { %v1995_v30 = vadd.f32 %v4076_v54, %v1994_v57 }
0x109f   :  { %v2004_v58 = vadd.f32 %v2000_v56, %v1811_v41 }
0x10a0   :  { %v2003_v59 = vadd.f32 %v1995_v30, %v1810_v37 }
0x10a1   :  { %v2008_v60 = vsel %vm212_vm6, %v2004_v58, 0.0 }
0x10a2   :  { %2009 = vadd.xlane.f32.xlu0 %v2008_v60  ;;  %v2005_v61 = vsel %vm212_vm6, %v2003_v59, 0.0 }
0x10a3   :  { %2006 = vadd.xlane.f32.xlu1 %v2005_v61 }
0x112f   :  { %v2010_v62 = vpop.xlane.xlu0 %2009 }
0x1130   :  { %v2012_v63 = vmul.f32 0.03125, %v2010_v62  ;;  %v2007_v0 = vpop.xlane.xlu1 %2006 }
0x1131   :  { %v2011_v1 = vmul.f32 0.03125, %v2007_v0 }
0x1132   :  { %v2014_v3 = vsub.f32 %v2004_v58, %v2012_v63 }
0x1133   :  { %v2013_v4 = vsub.f32 %v2003_v59, %v2011_v1 }
0x1134   :  { %v2016_v35 = vmul.f32 %v2014_v3, %v2014_v3 }
0x1135   :  { %v2015_v34 = vmul.f32 %v2013_v4, %v2013_v4 }
0x1136   :  { %v2020_v5 = vsel %vm212_vm6, %v2016_v35, 0.0 }
0x1137   :  { %2021 = vadd.xlane.f32.xlu0 %v2020_v5  ;;  %v2017_v6 = vsel %vm212_vm6, %v2015_v34, 0.0 }
0x1138   :  { %2018 = vadd.xlane.f32.xlu1 %v2017_v6 }
0x11c4   :  { %v2022_v15 = vpop.xlane.xlu0 %2021 }
0x11c5   :  { %v2024_v16 = vmul.f32 0.03125, %v2022_v15  ;;  %v2019_v17 = vpop.xlane.xlu1 %2018 }
0x11c6   :  { %v2023_v18 = vmul.f32 0.03125, %v2019_v17 }
0x11c7   :  { %v2026_v19 = vadd.f32 1e-05, %v2024_v16 }
0x11c8   :  { %v2025_v20 = vadd.f32 1e-05, %v2023_v18 }
0x11c9   :  { %4737 = vrsqrt.f32 %v2026_v19 }
0x11ca   :  { %4739 = vrsqrt.f32 %v2025_v20 }
0x11d3   :  { %v4738_v21 = vpop.eup %4737 }
0x11d4   :  { %v4740_v22 = vpop.eup %4739  ;;  %v2030_v24 = vmul.f32 %v4738_v21, %v2014_v3 }
0x11d5   :  { %v2029_v25 = vmul.f32 %v4740_v22, %v2013_v4 }
0x11d6   :  { %v2039_v26 = vmul.f32 %v4079_v40, %v2030_v24 }
0x11d7   :  { %v2038_v28 = vmul.f32 %v4079_v40, %v2029_v25 }
0x11d8   :  { %v5277_v31 = vadd.f32 %v4080_v27, %v2039_v26 }
0x11d9   :  { %v5275_v29 = vadd.f32 %v4080_v27, %v2038_v28 }
0x11db   :  { %4442 = vmatprep.mubr.msk.f32.mxu1 %vm212_vm6, %v5275_v29 }
0x11dc   :  { %4443 = vmatmul.mubr.msk.f32.vlgmr.msra.gmra.mrb[24].mxu1 %vm212_vm6, %v5277_v31 }
0x11dd   :  { %4447 = vmatprep.mubr.msk.f32.mxu1 %vm4813_vm7, %v4812_v7 }
0x12af   :  { %v4444_v33 = vpop.f32.mrb[24].mxu1 }
0x12b0   :  { %v5288_v36 = vadd.f32 %v4444_v33, %v4086_v32  ;;  %v2134_v37 = vpop.f32.mrb[25].mxu1 }
0x12b1   :  { %v5290_v38 = vadd.f32 %v4086_v32, %v2134_v37 }
0x12b2   :  { %2221 = vrot.lane.b32.xlu0 %v5288_v36, %s4814_s28 }
0x12b3   :  { %2144 = vrot.lane.b32.xlu1 %v5290_v38, %s4814_s28  ;;  %s5631_s28 = smov 112  }
0x1324   :  { %v2222_v42 = vpop.permute.xlu0 %2221 }
0x1325   :  { %v2145_v41 = vpop.permute.xlu1 %2144 }
0x1326   :  { %4446 = vmatpush3.xpose.msk.msra.mxu1 %vm297_vm8, %v2145_v41 }
0x1327   :  { %4450 = vmatprep.subr.mxu1 %v4812_v7 }
0x1329   :  { %4448 = vmatmul.mubr.msk.f32.vlgmr.msra.gmra.mrb[26].mxu1 %vm297_vm8, %v5290_v38 }
0x132a   :  { %4451 = vmatpush3.xpose.msk.msra.mxu1 %vm297_vm8, %v2222_v42  ;;  %4452 = vmatprep.mubr.msk.f32.mxu1 %vm4813_vm7, %v4812_v7 }
0x132b   :  { %4460 = vmatprep.subr.mxu1 %v4812_v7 }
0x132d   :  { %4453 = vmatmul.mubr.msk.f32.vlgmr.msra.gmra.mrb[28].mxu1 %vm297_vm8, %v5288_v36 }
0x132e   :  { %4462 = vmatprep.mubr.msk.f32.mxu1 %vm4813_vm7, %v4812_v7 }
0x13fc   :  { %v2216_v43 = vpop.f32.mrb[26].mxu1 }
0x13fd   :  { %v2297_v44 = vmul.f32 0.35355338, %v2216_v43  ;;  %v4449_v45 = vpop.f32.mrb[27].mxu1 }
0x13ff   :  { %v2299_v47 = vadd.f32 %v2297_v44, %v5024_v48 }
0x1400   :  { %v2293_v49 = vpop.f32.mrb[28].mxu1 }
0x1401   :  { %v2298_v50 = vmul.f32 0.35355338, %v2293_v49  ;;  %v4454_v23 = vpop.f32.mrb[29].mxu1  ;;  %v2301_v51 = vsel %vm297_vm8, %v2299_v47, -inf }
0x1402   :  { %2302 = vmax.xlane.f32.xlu1 %v2301_v51 }
0x1403   :  { %v2300_v52 = vadd.f32 %v2298_v50, %v5028_v53 }
0x1405   :  { %v2304_v54 = vsel %vm297_vm8, %v2300_v52, -inf }
0x1406   :  { %2305 = vmax.xlane.f32.xlu0 %v2304_v54 }
0x1413   :  { %2323 = vrot.lane.b32.xlu1 %v5290_v38, %s4815_s21 }
0x1417   :  { %2477 = vrot.lane.b32.xlu1 %v5290_v38, %s4816_s22 }
0x141b   :  { %2555 = vrot.lane.b32.xlu1 %v5288_v36, %s4816_s22  ;;  %s5633_s22 = smov 72  }
0x141c   :  { %2399 = vrot.lane.b32.xlu0 %v5288_v36, %s4815_s21  ;;  %s5632_s21 = smov 48  }
0x148f   :  { %v2303_v55 = vpop.xlane.xlu1 %2302 }
0x1490   :  { %v2307_v56 = vsub.f32 %v2299_v47, %v2303_v55 }
0x1492   :  { %v2309_v57 = vmul.f32 1.442695, %v2307_v56 }
0x1493   :  { %v2324_v30 = vpop.permute.xlu1 %2323  ;;  %v2306_v58 = vpop.xlane.xlu0 %2305 }
0x1494   :  { %4741 = vpow2.f32 %v2309_v57  ;;  %v2308_v59 = vsub.f32 %v2300_v52, %v2306_v58  ;;  %4456 = vmatpush3.msra.mxu0 %v2324_v30 }
0x1495   :  { %4465 = vmatprep.subr.mxu0 %v4812_v7 }
0x1496   :  { %v2311_v60 = vmul.f32 1.442695, %v2308_v59 }
0x1497   :  { %v2400_v61 = vpop.permute.xlu0 %2399  ;;  %v2478_v3 = vpop.permute.xlu1 %2477 }
0x1498   :  { %4743 = vpow2.f32 %v2311_v60  ;;  %4461 = vmatpush3.msra.mxu1 %v2400_v61 }
0x1499   :  { %4470 = vmatprep.subr.mxu1 %v4812_v7 }
0x149b   :  { %v2556_v4 = vpop.permute.xlu1 %2555 }
0x149e   :  { %v4742_v62 = vpop.eup %4741 }
0x149f   :  { %v2313_v63 = vsel %vm297_vm8, %v4742_v62, 0.0 }
0x14a0   :  { %2314 = vadd.xlane.f32.xlu1 %v2313_v63 }
0x14a2   :  { %v4744_v0 = vpop.eup %4743 }
0x14a3   :  { %v2316_v1 = vsel %vm297_vm8, %v4744_v0, 0.0 }
0x14a4   :  { %2317 = vadd.xlane.f32.xlu0 %v2316_v1 }
0x14b1   :  { %2553 = vrot.lane.b32.xlu1 %v5288_v36, %s4817_s20 }
0x14ba   :  { %2475 = vrot.lane.b32.xlu0 %v5290_v38, %s4817_s20  ;;  %s5634_s20 = smov 104  }
0x152d   :  { %v2315_v35 = vpop.xlane.xlu1 %2314 }
0x152e   :  { %4745 = vrcp.f32 %v2315_v35 }
0x1531   :  { %v2318_v34 = vpop.xlane.xlu0 %2317  ;;  %v2554_v14 = vpop.permute.xlu1 %2553 }
0x1532   :  { %4747 = vrcp.f32 %v2318_v34 }
0x1535   :  { %v2476_v39 = vpop.permute.xlu0 %2475 }
0x1538   :  { %v4746_v5 = vpop.eup %4745 }
0x1539   :  { %v2321_v6 = vmul.f32 %v4746_v5, %v4742_v62 }
0x153b   :  { %4458 = vmatmul.mubr.msk.f32.vlgmr.msra.gmra.mrb[18].mxu0 %vm297_vm8, %v2321_v6 }
0x153c   :  { %v4748_v10 = vpop.eup %4747  ;;  %4466 = vmatpush3.xpose.msk.msra.mxu0 %vm297_vm8, %v2478_v3  ;;  %4467 = vmatprep.mubr.msk.f32.mxu0 %vm4813_vm7, %v4812_v7 }
0x153d   :  { %v2322_v11 = vmul.f32 %v4748_v10, %v4744_v0  ;;  %4475 = vmatprep.subr.mxu0 %v4812_v7 }
0x153f   :  { %4463 = vmatmul.mubr.msk.f32.vlgmr.msra.gmra.mrb[30].mxu1 %vm297_vm8, %v2322_v11  ;;  %4468 = vmatmul.mubr.msk.f32.vlgmr.msra.gmra.mrb[20].mxu0 %vm297_vm8, %v2476_v39 }
0x1540   :  { %4471 = vmatpush3.xpose.msk.msra.mxu1 %vm297_vm8, %v2556_v4  ;;  %4472 = vmatprep.mubr.msk.f32.mxu1 %vm4813_vm7, %v4812_v7 }
0x1541   :  { %4480 = vmatprep.subr.mxu1 %v4812_v7  ;;  %4477 = vmatprep.mubr.msk.f32.mxu0 %vm4813_vm7, %v4812_v7 }
0x1543   :  { %4473 = vmatmul.mubr.msk.f32.vlgmr.msra.gmra.mrb[32].mxu1 %vm297_vm8, %v2554_v14 }
0x1544   :  { %4482 = vmatprep.mubr.msk.f32.mxu1 %vm4813_vm7, %v4812_v7 }
0x160e   :  { %v5344_v2 = vpop.f32.mrb[18].mxu0 }
0x160f   :  { %v4459_v13 = vpop.f32.mrb[19].mxu0 }
0x1612   :  { %v5346_v15 = vpop.f32.mrb[30].mxu1  ;;  %v2549_v16 = vpop.f32.mrb[20].mxu0 }
0x1613   :  { %v2631_v17 = vmul.f32 0.35355338, %v2549_v16  ;;  %v4464_v18 = vpop.f32.mrb[31].mxu1  ;;  %v4469_v19 = vpop.f32.mrb[21].mxu0 }
0x1615   :  { %v2633_v20 = vadd.f32 %v2631_v17, %v5024_v48 }
0x1616   :  { %v2627_v21 = vpop.f32.mrb[32].mxu1 }
0x1617   :  { %v2632_v40 = vmul.f32 0.35355338, %v2627_v21  ;;  %v4474_v22 = vpop.f32.mrb[33].mxu1  ;;  %v2635_v24 = vsel %vm297_vm8, %v2633_v20, -inf }
0x1618   :  { %2636 = vmax.xlane.f32.xlu0 %v2635_v24 }
0x1619   :  { %v2634_v25 = vadd.f32 %v2632_v40, %v5028_v53 }
0x161b   :  { %v2638_v26 = vsel %vm297_vm8, %v2634_v25, -inf }
0x161c   :  { %2639 = vmax.xlane.f32.xlu1 %v2638_v26 }
0x162d   :  { %2657 = vrot.lane.b32.xlu1 %v5290_v38, %s4818_s2 }
0x162e   :  { %2733 = vrot.lane.b32.xlu0 %v5288_v36, %s4818_s2  ;;  %s5635_s2 = smov 40  }
0x1631   :  { %2811 = vrot.lane.b32.xlu1 %v5290_v38, %s5630_s5 }
0x1635   :  { %2889 = vrot.lane.b32.xlu1 %v5288_v36, %s5630_s5 }
0x1639   :  { %2887 = vrot.lane.b32.xlu1 %v5288_v36, %s5631_s28 }
0x16a5   :  { %v2637_v27 = vpop.xlane.xlu0 %2636 }
0x16a6   :  { %v2641_v28 = vsub.f32 %v2633_v20, %v2637_v27 }
0x16a8   :  { %v2643_v32 = vmul.f32 1.442695, %v2641_v28 }
0x16a9   :  { %v2734_v33 = vpop.permute.xlu0 %2733  ;;  %v2640_v37 = vpop.xlane.xlu1 %2639 }
0x16aa   :  { %4749 = vpow2.f32 %v2643_v32  ;;  %v2642_v41 = vsub.f32 %v2634_v25, %v2640_v37  ;;  %4481 = vmatpush3.msra.mxu1 %v2734_v33 }
0x16ab   :  { %4490 = vmatprep.subr.mxu1 %v4812_v7 }
0x16ac   :  { %v2645_v42 = vmul.f32 1.442695, %v2642_v41 }
0x16ad   :  { %v2658_v43 = vpop.permute.xlu1 %2657 }
0x16ae   :  { %4751 = vpow2.f32 %v2645_v42  ;;  %4476 = vmatpush3.msra.mxu0 %v2658_v43 }
0x16af   :  { %4485 = vmatprep.subr.mxu0 %v4812_v7 }
0x16b1   :  { %v2812_v51 = vpop.permute.xlu1 %2811 }
0x16b4   :  { %v4750_v44 = vpop.eup %4749 }
0x16b5   :  { %v2647_v45 = vsel %vm297_vm8, %v4750_v44, 0.0  ;;  %v2890_v56 = vpop.permute.xlu1 %2889 }
0x16b6   :  { %2648 = vadd.xlane.f32.xlu0 %v2647_v45 }
0x16b8   :  { %v4752_v47 = vpop.eup %4751 }
0x16b9   :  { %v2650_v49 = vsel %vm297_vm8, %v4752_v47, 0.0  ;;  %v2888_v58 = vpop.permute.xlu1 %2887 }
0x16ba   :  { %2651 = vadd.xlane.f32.xlu0 %v2650_v49 }
0x16d0   :  { %2809 = vrot.lane.b32.xlu0 %v5290_v38, %s5631_s28  ;;  %s4829_s28 = smov [#allocation2]  }
0x1743   :  { %v2649_v50 = vpop.xlane.xlu0 %2648 }
0x1744   :  { %4753 = vrcp.f32 %v2649_v50 }
0x1747   :  { %v2652_v23 = vpop.xlane.xlu0 %2651 }
0x1748   :  { %4755 = vrcp.f32 %v2652_v23 }
0x174b   :  { %v2810_v30 = vpop.permute.xlu0 %2809 }
0x174e   :  { %v4754_v52 = vpop.eup %4753 }
0x174f   :  { %v2655_v54 = vmul.f32 %v4754_v52, %v4750_v44 }
0x1751   :  { %4478 = vmatmul.mubr.msk.f32.vlgmr.msra.gmra.mrb[22].mxu0 %vm297_vm8, %v2655_v54 }
0x1752   :  { %v4756_v55 = vpop.eup %4755  ;;  %4486 = vmatpush3.xpose.msk.msra.mxu0 %vm297_vm8, %v2812_v51  ;;  %4487 = vmatprep.mubr.msk.f32.mxu0 %vm4813_vm7, %v4812_v7 }
0x1753   :  { %v2656_v57 = vmul.f32 %v4756_v55, %v4752_v47  ;;  %4495 = vmatprep.subr.mxu0 %v4812_v7 }
0x1755   :  { %4483 = vmatmul.mubr.msk.f32.vlgmr.msra.gmra.mrb[34].mxu1 %vm297_vm8, %v2656_v57  ;;  %4488 = vmatmul.mubr.msk.f32.vlgmr.msra.gmra.mrb[24].mxu0 %vm297_vm8, %v2810_v30 }
0x1756   :  { %4491 = vmatpush3.xpose.msk.msra.mxu1 %vm297_vm8, %v2890_v56  ;;  %4492 = vmatprep.mubr.msk.f32.mxu1 %vm4813_vm7, %v4812_v7 }
0x1757   :  { %4500 = vmatprep.subr.mxu1 %v4812_v7  ;;  %4497 = vmatprep.mubr.msk.f32.mxu0 %vm4813_vm7, %v4812_v7 }
0x1759   :  { %4493 = vmatmul.mubr.msk.f32.vlgmr.msra.gmra.mrb[36].mxu1 %vm297_vm8, %v2888_v58 }
0x175a   :  { %4502 = vmatprep.mubr.msk.f32.mxu1 %vm4813_vm7, %v4812_v7 }
0x1824   :  { %v5384_v59 = vpop.f32.mrb[22].mxu0 }
0x1825   :  { %v4479_v60 = vpop.f32.mrb[23].mxu0 }
0x1828   :  { %v5386_v61 = vpop.f32.mrb[34].mxu1  ;;  %v2883_v62 = vpop.f32.mrb[24].mxu0 }
0x1829   :  { %v2965_v63 = vmul.f32 0.35355338, %v2883_v62  ;;  %v4484_v0 = vpop.f32.mrb[35].mxu1  ;;  %v4489_v1 = vpop.f32.mrb[25].mxu0 }
0x182b   :  { %v2967_v3 = vadd.f32 %v2965_v63, %v5024_v48 }
0x182c   :  { %v2961_v4 = vpop.f32.mrb[36].mxu1 }
0x182d   :  { %v2966_v35 = vmul.f32 0.35355338, %v2961_v4  ;;  %v4494_v34 = vpop.f32.mrb[37].mxu1  ;;  %v2969_v5 = vsel %vm297_vm8, %v2967_v3, -inf }
0x182e   :  { %2970 = vmax.xlane.f32.xlu0 %v2969_v5 }
0x182f   :  { %v2968_v6 = vadd.f32 %v2966_v35, %v5028_v53 }
0x1831   :  { %v2972_v10 = vsel %vm297_vm8, %v2968_v6, -inf }
0x1832   :  { %2973 = vmax.xlane.f32.xlu1 %v2972_v10 }
0x1843   :  { %2991 = vrot.lane.b32.xlu1 %v5290_v38, %s5632_s21 }
0x1844   :  { %3067 = vrot.lane.b32.xlu0 %v5288_v36, %s5632_s21  ;;  %s4024_s21 = sshll.u32 %s4829_s28, 4  ;;  %s4025_s21 = int_to_ptr.vmem [resolvable:$true] %s4024_s21 }
0x1845   :  { %p4792_p1 = scmp.lt.s32.totalorder %s4025_s21, %s4025_s21 }
0x1847   :  { %3145 = vrot.lane.b32.xlu1 %v5290_v38, %s5633_s22 }
0x184b   :  { %3223 = vrot.lane.b32.xlu1 %v5288_v36, %s5633_s22  ;;  %s4787_s22 = scalar_lea.vmem %s4025_s21, 32 }
0x184c   :  { %p4788_p0 = scmp.ne.s32.totalorder %s4025_s21, %s4787_s22  ;;  %p4793_p2 = scmp.lt.s32.totalorder %s4787_s22, %s4787_s22 }
0x184e   :  { %p4794_p3 = por %p4793_p2, %p4792_p1 }
0x184f   :  { %3221 = vrot.lane.b32.xlu1 %v5288_v36, %s5634_s20 }
0x1850   :  { %p4795_p4 = pnand %p4794_p3, %p4788_p0 }
0x18bb   :  { %v2971_v11 = vpop.xlane.xlu0 %2970 }
0x18bc   :  { %v2975_v39 = vsub.f32 %v2967_v3, %v2971_v11  ;;  %v4114_v11 = vld [vmem:[%s5590_s6 + $0x28] sm:$0xff] }
0x18be   :  { %v2977_v14 = vmul.f32 1.442695, %v2975_v39 }
0x18bf   :  { %v3068_v13 = vpop.permute.xlu0 %3067  ;;  %v2974_v16 = vpop.xlane.xlu1 %2973 }
0x18c0   :  { %4757 = vpow2.f32 %v2977_v14  ;;  %v2976_v17 = vsub.f32 %v2968_v6, %v2974_v16  ;;  %4501 = vmatpush3.msra.mxu1 %v3068_v13  ;;  %v4115_v14 = vld [vmem:[%s5590_s6 + $0x30] sm:$0xff]  ;;  %v4116_v13 = vld [vmem:[%s5590_s6 + $0x38] sm:$0xff] }
0x18c1   :  { %4510 = vmatprep.subr.mxu1 %v4812_v7  ;;  %v4641_v16 = vpack.c.bf16 %v4116_v13, %v4115_v14  ;;  %v4122_v13 = vld [vmem:[%s5592_s8 + $0x1] ss:$0 sm:$0xff] }
0x18c2   :  { %v2979_v18 = vmul.f32 1.442695, %v2976_v17 }
0x18c3   :  { %v2992_v19 = vpop.permute.xlu1 %2991 }
0x18c4   :  { %4759 = vpow2.f32 %v2979_v18  ;;  %4496 = vmatpush3.msra.mxu0 %v2992_v19 }
0x18c5   :  { %4505 = vmatprep.subr.mxu0 %v4812_v7 }
0x18c7   :  { %v3146_v26 = vpop.permute.xlu1 %3145 }
0x18ca   :  { %v4758_v20 = vpop.eup %4757 }
0x18cb   :  { %v2981_v21 = vsel %vm297_vm8, %v4758_v20, 0.0  ;;  %v3224_v33 = vpop.permute.xlu1 %3223 }
0x18cc   :  { %2982 = vadd.xlane.f32.xlu0 %v2981_v21 }
0x18ce   :  { %v4760_v40 = vpop.eup %4759 }
0x18cf   :  { %v2984_v22 = vsel %vm297_vm8, %v4760_v40, 0.0  ;;  %v3222_v42 = vpop.permute.xlu1 %3221 }
0x18d0   :  { %2985 = vadd.xlane.f32.xlu0 %v2984_v22 }
0x18e6   :  { %3143 = vrot.lane.b32.xlu0 %v5290_v38, %s5634_s20 }
0x1959   :  { %v2983_v24 = vpop.xlane.xlu0 %2982 }
0x195a   :  { %4761 = vrcp.f32 %v2983_v24 }
0x195d   :  { %v2986_v25 = vpop.xlane.xlu0 %2985 }
0x195e   :  { %4763 = vrcp.f32 %v2986_v25 }
0x1961   :  { %v3144_v41 = vpop.permute.xlu0 %3143 }
0x1964   :  { %v4762_v27 = vpop.eup %4761 }
0x1965   :  { %v2989_v28 = vmul.f32 %v4762_v27, %v4758_v20 }
0x1967   :  { %4498 = vmatmul.mubr.msk.f32.vlgmr.msra.gmra.mrb[26].mxu0 %vm297_vm8, %v2989_v28 }
0x1968   :  { %v4764_v32 = vpop.eup %4763  ;;  %4506 = vmatpush3.xpose.msk.msra.mxu0 %vm297_vm8, %v3146_v26  ;;  %4507 = vmatprep.mubr.msk.f32.mxu0 %vm4813_vm7, %v4812_v7 }
0x1969   :  { %v2990_v37 = vmul.f32 %v4764_v32, %v4760_v40  ;;  %4515 = vmatprep.subr.mxu0 %v4812_v7 }
0x196b   :  { %4503 = vmatmul.mubr.msk.f32.vlgmr.msra.gmra.mrb[38].mxu1 %vm297_vm8, %v2990_v37  ;;  %4508 = vmatmul.mubr.msk.f32.vlgmr.msra.gmra.mrb[28].mxu0 %vm297_vm8, %v3144_v41 }
0x196c   :  { %4511 = vmatpush3.xpose.msk.msra.mxu1 %vm297_vm8, %v3224_v33  ;;  %4512 = vmatprep.mubr.msk.f32.mxu1 %vm4813_vm7, %v4812_v7 }
0x196d   :  { %4520 = vmatprep.subr.mxu1 %v4812_v7  ;;  %4517 = vmatprep.mubr.msk.f32.mxu0 %vm4813_vm7, %v4812_v7 }
0x196f   :  { %4513 = vmatmul.mubr.msk.f32.vlgmr.msra.gmra.mrb[40].mxu1 %vm297_vm8, %v3222_v42 }
0x1970   :  { %4522 = vmatprep.mubr.msk.f32.mxu1 %vm4813_vm7, %v4812_v7 }
0x1a3a   :  { %v3063_v43 = vpop.f32.mrb[26].mxu0 }
0x1a3b   :  { %v4499_v44 = vpop.f32.mrb[27].mxu0 }
0x1a3e   :  { %v3139_v45 = vpop.f32.mrb[38].mxu1  ;;  %v3217_v47 = vpop.f32.mrb[28].mxu0 }
0x1a3f   :  { %v3299_v49 = vmul.f32 0.35355338, %v3217_v47  ;;  %v4504_v50 = vpop.f32.mrb[39].mxu1  ;;  %v4509_v23 = vpop.f32.mrb[29].mxu0 }
0x1a41   :  { %v3301_v51 = vadd.f32 %v3299_v49, %v5024_v48 }
0x1a42   :  { %v3295_v52 = vpop.f32.mrb[40].mxu1 }
0x1a43   :  { %v3300_v54 = vmul.f32 0.35355338, %v3295_v52  ;;  %v4514_v55 = vpop.f32.mrb[41].mxu1  ;;  %v3303_v56 = vsel %vm297_vm8, %v3301_v51, -inf }
0x1a44   :  { %3304 = vmax.xlane.f32.xlu0 %v3303_v56 }
0x1a45   :  { %v3302_v57 = vadd.f32 %v3300_v54, %v5028_v53 }
0x1a47   :  { %v3306_v30 = vsel %vm297_vm8, %v3302_v57, -inf }
0x1a48   :  { %3307 = vmax.xlane.f32.xlu1 %v3306_v30 }
0x1a59   :  { %3325 = vrot.lane.b32.xlu1 %v5290_v38, %s5635_s2 }
0x1a5d   :  { %3479 = vrot.lane.b32.xlu1 %v5384_v59, %s5636_s25 }
0x1a61   :  { %3481 = vrot.lane.b32.xlu1 %v5386_v61, %s5636_s25 }
0x1a65   :  { %3489 = vrot.lane.b32.xlu1 %v3139_v45, %s5637_s19 }
0x1ad1   :  { %v3305_v48 = vpop.xlane.xlu0 %3304 }
0x1ad2   :  { %v3309_v58 = vsub.f32 %v3301_v51, %v3305_v48 }
0x1ad4   :  { %v3311_v60 = vmul.f32 1.442695, %v3309_v58  ;;  %v4126_v58 = vld [vmem:[%s5594_s10 + $0x28] sm:$0xff] }
0x1ad5   :  { %v3308_v62 = vpop.xlane.xlu1 %3307 }
0x1ad6   :  { %4765 = vpow2.f32 %v3311_v60  ;;  %v3310_v53 = vsub.f32 %v3302_v57, %v3308_v62  ;;  %v4127_v62 = vld [vmem:[%s5594_s10 + $0x30] sm:$0xff] }
0x1ad8   :  { %v3313_v63 = vmul.f32 1.442695, %v3310_v53  ;;  %v4128_v53 = vld [vmem:[%s5594_s10 + $0x38] sm:$0xff] }
0x1ad9   :  { %v3326_v0 = vpop.permute.xlu1 %3325 }
0x1ada   :  { %4767 = vpow2.f32 %v3313_v63  ;;  %4516 = vmatpush3.msra.mxu0 %v3326_v0  ;;  %v4649_v63 = vpack.c.bf16 %v4128_v53, %v4127_v62  ;;  %v4133_v0 = vld [vmem:[%s5596_s12 + $0x40] sm:$0xff] }
0x1add   :  { %v3480_v21 = vpop.permute.xlu1 %3479 }
0x1ade   :  { %v3501_v24 = vsel %vm297_vm8, %v5344_v2, %v3480_v21  ;;  %v4118_v2 = vld [vmem:[%s5591_s7 + $0x1] ss:$0 sm:$0xff] }
0x1ae0   :  { %v4766_v1 = vpop.eup %4765 }
0x1ae1   :  { %v3315_v38 = vsel %vm297_vm8, %v4766_v1, 0.0  ;;  %v3482_v40 = vpop.permute.xlu1 %3481 }
0x1ae2   :  { %3316 = vadd.xlane.f32.xlu0 %v3315_v38  ;;  %v3502_v32 = vsel %vm297_vm8, %v5346_v15, %v3482_v40  ;;  %v4135_v38 = vld [vmem:[%s5596_s12 + $0x50] sm:$0xff] }
0x1ae4   :  { %v4768_v59 = vpop.eup %4767 }
0x1ae5   :  { %v3318_v3 = vsel %vm297_vm8, %v4768_v59, 0.0  ;;  %v3490_v25 = vpop.permute.xlu1 %3489 }
0x1ae6   :  { %3319 = vadd.xlane.f32.xlu0 %v3318_v3  ;;  %v3504_v33 = vsel %vm1667_vm12, %v3502_v32, %v3490_v25  ;;  %v4136_v3 = vld [vmem:[%s5596_s12 + $0x58] sm:$0xff] }
0x1ae7   :  { %v4140_v25 = vld [vmem:[%s5596_s12 + $0x78] sm:$0xff] }
0x1afc   :  { %3401 = vrot.lane.b32.xlu0 %v5288_v36, %s5635_s2  ;;  %v4113_v36 = vld [vmem:[%s5590_s6 + $0x20] sm:$0xff] }
0x1afd   :  { %v4637_v39 = vpack.c.bf16 %v4114_v11, %v4113_v36 }
0x1aff   :  { %4638 = vmatprep.subr.bf16.mxu0 %v4637_v39 }
0x1b00   :  { %3487 = vrot.lane.b32.xlu0 %v3063_v43, %s5637_s19 }
0x1b6f   :  { %v3317_v61 = vpop.xlane.xlu0 %3316 }
0x1b70   :  { %4769 = vrcp.f32 %v3317_v61  ;;  %v4657_v61 = vpack.c.bf16 %v4136_v3, %v4135_v38  ;;  %v3931_v3 = vld [vmem:[%s5600_s16 + $0x10] sm:$0xff] }
0x1b71   :  { %v4673_v9 = vpack.c.bf16 %v3932_v8, %v3931_v3 }
0x1b73   :  { %v3320_v4 = vpop.xlane.xlu0 %3319 }
0x1b74   :  { %4771 = vrcp.f32 %v3320_v4  ;;  %v4137_v4 = vld [vmem:[%s5596_s12 + $0x60] sm:$0xff] }
0x1b77   :  { %v3402_v35 = vpop.permute.xlu0 %3401 }
0x1b78   :  { %4521 = vmatpush3.msra.mxu1 %v3402_v35  ;;  %v4138_v35 = vld [vmem:[%s5596_s12 + $0x68] sm:$0xff] }
0x1b7a   :  { %v4770_v34 = vpop.eup %4769 }
0x1b7b   :  { %v3323_v5 = vmul.f32 %v4770_v34, %v4766_v1  ;;  %v3488_v22 = vpop.permute.xlu0 %3487  ;;  %v4134_v1 = vld [vmem:[%s5596_s12 + $0x48] sm:$0xff]  ;;  %v4661_v34 = vpack.c.bf16 %v4138_v35, %v4137_v4 }
0x1b7c   :  { %v3503_v26 = vsel %vm1667_vm12, %v3501_v24, %v3488_v22  ;;  %v4139_v24 = vld [vmem:[%s5596_s12 + $0x70] sm:$0xff] }
0x1b7d   :  { %4518 = vmatmul.mubr.msk.f32.vlgmr.msra.gmra.mrb[30].mxu0 %vm297_vm8, %v3323_v5 }
0x1b7e   :  { %v4772_v6 = vpop.eup %4771  ;;  %4640 = vmatpush3.bf16.msra.mxu0 %v4637_v39 }
0x1b7f   :  { %v3324_v10 = vmul.f32 %v4772_v6, %v4768_v59  ;;  %4642 = vmatprep.subr.bf16.mxu0 %v4641_v16  ;;  %v4653_v59 = vpack.c.bf16 %v4134_v1, %v4133_v0  ;;  %v3929_v1 = vld [vmem:[%s5600_s16] sm:$0xff] }
0x1b81   :  { %4523 = vmatmul.mubr.msk.f32.vlgmr.msra.gmra.mrb[42].mxu1 %vm297_vm8, %v3324_v10 }
0x1b82   :  { %4644 = vmatpush3.bf16.msra.mxu0 %v4641_v16 }
0x1b83   :  { %4654 = vmatprep.subr.bf16.mxu0 %v4653_v59 }
0x1c50   :  { %v3397_v17 = vpop.f32.mrb[30].mxu0 }
0x1c51   :  { %3495 = vrot.lane.b32.xlu0 %v3397_v17, %s5638_s1  ;;  %v4519_v18 = vpop.f32.mrb[31].mxu0  ;;  %v4124_v17 = vld [vmem:[%s5593_s9 + $0x1] ss:$0 sm:$0xff] }
0x1c54   :  { %v3473_v19 = vpop.f32.mrb[42].mxu1 }
0x1c55   :  { %3497 = vrot.lane.b32.xlu1 %v3473_v19, %s5638_s1  ;;  %v4524_v20 = vpop.f32.mrb[43].mxu1 }
0x1cc3   :  { %v3496_v27 = vpop.permute.xlu0 %3495 }
0x1cc4   :  { %v3505_v28 = vsel %vm1670_vm11, %v3503_v26, %v3496_v27  ;;  %v4665_v26 = vpack.c.bf16 %v4140_v25, %v4139_v24  ;;  %v4130_v27 = vld [vmem:[%s5595_s11 + $0x1] ss:$0 sm:$0xff] }
0x1cc5   :  { %4533 = vmatprep.mubr.msk.f32.mxu0 %vm212_vm6, %v3505_v28 }
0x1cc7   :  { %v3498_v37 = vpop.permute.xlu1 %3497 }
0x1cc8   :  { %v3506_v41 = vsel %vm1670_vm11, %v3504_v33, %v3498_v37 }
0x1cc9   :  { %4534 = vmatmul.mubr.msk.f32.vlgmr.msra.gmra.mrb[32].mxu0 %vm212_vm6, %v3506_v41 }
0x1cca   :  { %4656 = vmatpush3.bf16.msra.mxu0 %v4653_v59  ;;  %v4828_v59 = vmov 0.0|0.0  }
0x1ccb   :  { %4658 = vmatprep.subr.bf16.mxu0 %v4657_v61 }
0x1cce   :  { %4660 = vmatpush3.bf16.msra.mxu0 %v4657_v61 }
0x1ccf   :  { %4662 = vmatprep.subr.bf16.mxu0 %v4661_v34 }
0x1cd2   :  { %4664 = vmatpush3.bf16.msra.mxu0 %v4661_v34 }
0x1cd3   :  { %4666 = vmatprep.subr.bf16.mxu0 %v4665_v26 }
0x1cd6   :  { %4668 = vmatpush3.bf16.msra.mxu0 %v4665_v26 }
0x1d9c   :  { %v4535_v42 = vpop.f32.mrb[32].mxu0 }
0x1d9d   :  { %v3598_v43 = vadd.f32 %v4535_v42, %v4118_v2  ;;  %v3592_v44 = vpop.f32.mrb[33].mxu0  ;;  %v4142_v42 = vld [vmem:[%s5597_s13 + $0x1] ss:$0 sm:$0xff] }
0x1d9e   :  { %v3593_v45 = vadd.f32 %v4118_v2, %v3592_v44 }
0x1d9f   :  { %v3602_v47 = vadd.f32 %v3598_v43, %v5277_v31 }
0x1da0   :  { %v3601_v49 = vadd.f32 %v3593_v45, %v5275_v29  ;;  %v4125_v29 = vld [vmem:[%s5594_s10 + $0x20] sm:$0xff] }
0x1da1   :  { %v3606_v15 = vsel %vm212_vm6, %v3602_v47, 0.0  ;;  %v4645_v60 = vpack.c.bf16 %v4126_v58, %v4125_v29 }
0x1da2   :  { %3607 = vadd.xlane.f32.xlu1 %v3606_v15  ;;  %v3603_v50 = vsel %vm212_vm6, %v3601_v49, 0.0 }
0x1da3   :  { %3604 = vadd.xlane.f32.xlu0 %v3603_v50  ;;  %4646 = vmatprep.subr.bf16.mxu1 %v4645_v60 }
0x1da4   :  { %4648 = vmatpush3.bf16.msra.mxu1 %v4645_v60 }
0x1da5   :  { %4650 = vmatprep.subr.bf16.mxu1 %v4649_v63 }
0x1da8   :  { %4652 = vmatpush3.bf16.msra.mxu1 %v4649_v63 }
0x1da9   :  { %4669 = vmatprep.subr.bf16.mxu1 %v4828_v59 }
0x1e2f   :  { %v3608_v23 = vpop.xlane.xlu1 %3607 }
0x1e30   :  { %v3610_v51 = vmul.f32 0.03125, %v3608_v23  ;;  %v3605_v52 = vpop.xlane.xlu0 %3604 }
0x1e31   :  { %v3609_v54 = vmul.f32 0.03125, %v3605_v52 }
0x1e32   :  { %v3612_v55 = vsub.f32 %v3602_v47, %v3610_v51  ;;  %v4785_v51 = vld [vmem:[%s5629_s0] sm:$0x1] }
0x1e33   :  { %v3611_v56 = vsub.f32 %v3601_v49, %v3609_v54  ;;  %vm186_vm14 = vcmp.ne.s32.totalorder %v4785_v51, 0 }
0x1e34   :  { %v3614_v48 = vmul.f32 %v3612_v55, %v3612_v55  ;;  %v4039_v52 = vsel %vm186_vm14, 1.0, %v4812_v7 }
0x1e35   :  { %v3613_v57 = vmul.f32 %v3611_v56, %v3611_v56  ;;  %v193_v54 = vsel %vm192_vm15, %v4039_v52, 0.0 }
0x1e36   :  { %v3618_v31 = vsel %vm212_vm6, %v3614_v48, 0.0 }
0x1e37   :  { %v3615_v30 = vsel %vm212_vm6, %v3613_v57, 0.0 }
0x1e38   :  { %3616 = vadd.xlane.f32.xlu0 %v3615_v30 }
0x1e3c   :  { %3619 = vadd.xlane.f32.xlu0 %v3618_v31  ;;  %v4786_v31 = vld [vmem:[%s5629_s0 + $0x1] sm:$0x1] }
0x1e3d   :  { %vm187_vm0 = vcmp.ne.s32.totalorder %v4786_v31, 0 }
0x1e3e   :  { %v4040_v62 = vsel %vm187_vm0, 1.0, %v4812_v7 }
0x1e3f   :  { %v196_v0 = vsel %vm192_vm15, %v4040_v62, 0.0 }
0x1ec5   :  { %v3617_v5 = vpop.xlane.xlu0 %3616 }
0x1ec6   :  { %v3621_v6 = vmul.f32 0.03125, %v3617_v5 }
0x1ec8   :  { %v3623_v10 = vadd.f32 1e-05, %v3621_v6 }
0x1ec9   :  { %v3620_v36 = vpop.xlane.xlu0 %3619 }
0x1eca   :  { %4773 = vrsqrt.f32 %v3623_v10  ;;  %v3622_v11 = vmul.f32 0.03125, %v3620_v36 }
0x1ecc   :  { %v3624_v39 = vadd.f32 1e-05, %v3622_v11  ;;  %v4146_v11 = vld [vmem:[%s5598_s14 + $0x1] ss:$0 sm:$0xff] }
0x1ece   :  { %4775 = vrsqrt.f32 %v3624_v39 }
0x1ed4   :  { %v4774_v14 = vpop.eup %4773 }
0x1ed5   :  { %v3627_v16 = vmul.f32 %v4774_v14, %v3611_v56 }
0x1ed7   :  { %v3637_v18 = vmul.f32 %v4122_v13, %v3627_v16 }
0x1ed8   :  { %v4776_v19 = vpop.eup %4775 }
0x1ed9   :  { %v3628_v20 = vmul.f32 %v4776_v19, %v3612_v55  ;;  %v3647_v21 = vadd.f32 %v4124_v17, %v3637_v18  ;;  %v4148_v18 = vld [vmem:[%s5599_s15 + $0x1] ss:$0 sm:$0xff] }
0x1edb   :  { %v3638_v40 = vmul.f32 %v4122_v13, %v3628_v20  ;;  %4544 = vmatprep.mubr.msk.f32.mxu1 %vm212_vm6, %v3647_v21 }
0x1edd   :  { %v3648_v22 = vadd.f32 %v4124_v17, %v3638_v40 }
0x1edf   :  { %4545 = vmatmul.mubr.msk.f32.vlgmr.msra.gmra.mrb[44].mxu1 %vm212_vm6, %v3648_v22 }
0x1ee0   :  { %4574 = vmatprep.mubr.msk.f32.mxu1 %vm4813_vm7, %v4812_v7  ;;  %v3930_v7 = vld [vmem:[%s5600_s16 + $0x8] sm:$0xff] }
0x1ee1   :  { %v4670_v38 = vpack.c.bf16 %v3930_v7, %v3929_v1 }
0x1ee3   :  { %4671 = vmatpush3.bf16.msra.mxu1 %v4670_v38 }
0x1ee4   :  { %4672 = vmatprep.subr.bf16.mxu1 %v4828_v59 }
0x1ee7   :  { %4674 = vmatpush3.bf16.msra.mxu1 %v4673_v9 }
0x1fb2   :  { %v4546_v28 = vpop.f32.mrb[44].mxu1 }
0x1fb3   :  { %v3740_v32 = vadd.f32 %v4546_v28, %v4130_v27  ;;  %v3734_v33 = vpop.f32.mrb[45].mxu1 }
0x1fb4   :  { %v3735_v37 = vadd.f32 %v4130_v27, %v3734_v33 }
0x1fb5   :  { %v3744_v2 = vmax.f32 %v3740_v32, 0.0 }
0x1fb6   :  { %v3743_v41 = vmax.f32 %v3735_v37, 0.0 }
0x1fb8   :  { %4563 = vmatprep.mubr.msk.f32.mxu0 %vm1921_vm13, %v3743_v41 }
0x1fb9   :  { %4564 = vmatmul.mubr.msk.f32.vlgmr.msra.gmra.mrb[34].mxu0 %vm1921_vm13, %v3744_v2 }
0x208c   :  { %v4565_v43 = vpop.f32.mrb[34].mxu0 }
0x208d   :  { %v3840_v44 = vadd.f32 %v4565_v43, %v4142_v42  ;;  %v3834_v45 = vpop.f32.mrb[35].mxu0 }
0x208e   :  { %v3835_v47 = vadd.f32 %v4142_v42, %v3834_v45 }
0x208f   :  { %v3844_v49 = vadd.f32 %v3840_v44, %v3648_v22 }
0x2090   :  { %v3843_v15 = vadd.f32 %v3835_v47, %v3647_v21 }
0x2091   :  { %v3848_v50 = vsel %vm212_vm6, %v3844_v49, 0.0 }
0x2092   :  { %3849 = vadd.xlane.f32.xlu0 %v3848_v50  ;;  %v3845_v23 = vsel %vm212_vm6, %v3843_v15, 0.0 }
0x2093   :  { %3846 = vadd.xlane.f32.xlu1 %v3845_v23 }
0x2097   :  { %194 = vadd.xlane.f32.xlu1 %v193_v54 }
0x211f   :  { %v3850_v55 = vpop.xlane.xlu0 %3849 }
0x2120   :  { %v3852_v56 = vmul.f32 0.03125, %v3850_v55  ;;  %v3847_v57 = vpop.xlane.xlu1 %3846 }
0x2121   :  { %v3851_v30 = vmul.f32 0.03125, %v3847_v57  ;;  %v4149_v57 = vld [vmem:[%s5601_s17] ss:$0 sm:$0xff] }
0x2122   :  { %v3854_v48 = vsub.f32 %v3844_v49, %v3852_v56 }
0x2123   :  { %v3853_v29 = vsub.f32 %v3843_v15, %v3851_v30 }
0x2124   :  { %v3856_v58 = vmul.f32 %v3854_v48, %v3854_v48 }
0x2125   :  { %v3855_v60 = vmul.f32 %v3853_v29, %v3853_v29 }
0x2126   :  { %v3860_v53 = vsel %vm212_vm6, %v3856_v58, 0.0 }
0x2127   :  { %3861 = vadd.xlane.f32.xlu0 %v3860_v53  ;;  %v3857_v63 = vsel %vm212_vm6, %v3855_v60, 0.0 }
0x2128   :  { %3858 = vadd.xlane.f32.xlu1 %v3857_v63 }
0x212b   :  { %197 = vadd.xlane.f32.xlu0 %v196_v0 }
0x2139   :  { %4697 = vperm.xlu1 %4695, %v4696_v12   ;;  %v195_v12 = vpop.xlane.xlu1 %194 }
0x213a   :  { %v199_v21 = vmax.f32 %v195_v12, 1.0 }
0x213c   :  { %v3920_v28 = vrot.slane %v199_v21, %v5020_v46 }
0x21b4   :  { %v3862_v61 = vpop.xlane.xlu0 %3861 }
0x21b5   :  { %v3864_v4 = vmul.f32 0.03125, %v3862_v61  ;;  %v3859_v35 = vpop.xlane.xlu1 %3858 }
0x21b6   :  { %v3863_v34 = vmul.f32 0.03125, %v3859_v35 }
0x21b7   :  { %v3866_v5 = vadd.f32 1e-05, %v3864_v4 }
0x21b8   :  { %v3865_v6 = vadd.f32 1e-05, %v3863_v34  ;;  %v198_v10 = vpop.xlane.xlu0 %197 }
0x21b9   :  { %4777 = vrsqrt.f32 %v3866_v5  ;;  %v4698_v39 = vpop.permute.xlu1 %4697  ;;  %v200_v16 = vmax.f32 %v198_v10, 1.0 }
0x21ba   :  { %4779 = vrsqrt.f32 %v3865_v6  ;;  %v4700_v20 = vunpack.i.h.bf16 %v4698_v39  ;;  %v4699_v22 = vunpack.i.l.bf16 %v4698_v39 }
0x21bb   :  { %v3924_v25 = vrot.slane %v200_v16, %v5020_v46 }
0x21bd   :  { %4781 = vrcp.f32 %v3924_v25 }
0x21be   :  { %4783 = vrcp.f32 %v3920_v28 }
0x21c3   :  { %v4778_v36 = vpop.eup %4777 }
0x21c4   :  { %v4780_v14 = vpop.eup %4779  ;;  %v3870_v13 = vmul.f32 %v4778_v36, %v3854_v48 }
0x21c5   :  { %v3869_v17 = vmul.f32 %v4780_v14, %v3853_v29 }
0x21c6   :  { %v3880_v19 = vmul.f32 %v4146_v11, %v3870_v13 }
0x21c7   :  { %v3879_v40 = vmul.f32 %v4146_v11, %v3869_v17  ;;  %v4782_v50 = vpop.eup %4781 }
0x21c8   :  { %v3890_v24 = vadd.f32 %v4148_v18, %v3880_v19  ;;  %v4784_v52 = vpop.eup %4783 }
0x21c9   :  { %v3889_v26 = vadd.f32 %v4148_v18, %v3879_v40 }
0x21ca   :  { %v3902_v27 = vmul.f32 %v4700_v20, %v3890_v24 }
0x21cb   :  { %v3901_v32 = vmul.f32 %v4699_v22, %v3889_v26 }
0x21cc   :  { %v3910_v33 = vsel %vm212_vm6, %v3902_v27, 0.0 }
0x21cd   :  { %v3911_v37 = vrot.slane %v3910_v33, 4  ;;  %v3903_v41 = vsel %vm212_vm6, %v3901_v32, 0.0 }
0x21ce   :  { %v3904_v2 = vrot.slane %v3903_v41, 4 }
0x21cf   :  { %v3912_v42 = vadd.f32 %v3911_v37, %v3910_v33 }
0x21d0   :  { %v3905_v43 = vadd.f32 %v3904_v2, %v3903_v41 }
0x21d1   :  { %v3913_v44 = vrot.slane %v3912_v42, 2 }
0x21d2   :  { %v3906_v45 = vrot.slane %v3905_v43, 2 }
0x21d3   :  { %v3914_v47 = vadd.f32 %v3913_v44, %v3912_v42 }
0x21d4   :  { %v3907_v49 = vadd.f32 %v3906_v45, %v3905_v43 }
0x21d5   :  { %v3915_v15 = vrot.slane %v3914_v47, 1 }
0x21d6   :  { %v3908_v23 = vrot.slane %v3907_v49, 1 }
0x21d7   :  { %v3916_v51 = vadd.f32 %v3915_v15, %v3914_v47 }
0x21d8   :  { %v3909_v46 = vadd.f32 %v3908_v23, %v3907_v49 }
0x21d9   :  { %v3928_v54 = vmul.f32 %v4782_v50, %v3916_v51 }
0x21da   :  { %v3926_v55 = vmul.f32 %v4784_v52, %v3909_v46 }
0x21dc   :  { %v3943_v56 = vsel %vm3942_vm1, %v3928_v54, %v3926_v55 }
0x21dd   :  { %4575 = vmatmul.mubr.msk.f32.vlgmr.msra.gmra.mrb[46].mxu1 %vm212_vm6, %v3943_v56 }
0x22b0   :  { %v4012_v30 = vpop.f32.mrb[46].mxu1 }
0x22b1   :  { %v4013_v48 = vadd.f32 %v4149_v57, %v4012_v30  ;;  %v4576_v31 = vpop.f32.mrb[47].mxu1 }
0x22b3   :  { %4017 = vst.msk [vmem:[#allocation2] sm:$0x3] %vm4016_vm2, %v4013_v48 }
0x22b4   :  { %4798 = shalt.err (!%p4795_p4)
}
0x22b5   :  { %s4799_s2 = scalar_lea.hbm %s5602_s18, 32 }
0x22b6   :  { %p4800_p5 = scmp.ne.s32.totalorder %s5602_s18, %s4799_s2  ;;  %p4803_p6 = scmp.lt.u32.totalorder %s4799_s2, %s5602_s18 }
0x22b8   :  { %p4805_p7 = pnand %p4803_p6, %p4800_p5 }
0x22ba   :  { %4808 = shalt.err (!%p4805_p7)
}
0x22bb   :  { %4027 = dma.vmem_to_hbm [thread:$0]  %s4025_s21, 32, %s5602_s18, [#allocation3]  }
0x22bc   :  { %4809 = dma.done.wait [#allocation3], 32  }
0x22bd   :  { %4810 = vsyncadd [#allocation3], 4294967264 }
0x22be   :  { %4031 = vsyncpa [#allocation3], 1 }

</bundles_post_ra>
